<compile_context>
chip_gen: v7x
topology: tpu7x:2x2x1
jax: 0.10.0
libtpu: 0.0.40
codegen_flags: <defaults>
</compile_context>

<pallas_src>
import functools
import math

import jax
import jax.numpy as jnp
from jax import lax
from jax.experimental import pallas as pl
from jax.experimental.pallas import tpu as pltpu

SIGMA = 0.1
_LANE = 128
_MAX_WIDTH = 8192
# Per-block footprint; with in+out double-buffered this stays well inside even
# v5e's 16 MiB scoped-VMEM default (2 MiB * 2 bufs * 2 arrays = 8 MiB).
_TARGET_BLOCK_BYTES = 2 * 1024 * 1024


def _i32(v):
    """Interpret a 32-bit unsigned constant as a signed int32 Python int."""
    v &= 0xFFFFFFFF
    return v - (1 << 32) if v >= (1 << 31) else v


_M1 = _i32(0x85EBCA6B)      # murmur3 fmix32 constants
_M2 = _i32(0xC2B2AE35)
_GOLDEN = _i32(0x9E3779B9)  # stream separator for the second uniform

# Even Taylor polynomial of cos(y) on [-pi, pi], Horner order (max err ~4e-6).
_COS_COEFFS = (
    -1.0 / 87178291200.0,   # y^14
    1.0 / 479001600.0,      # y^12
    -1.0 / 3628800.0,       # y^10
    1.0 / 40320.0,          # y^8
    -1.0 / 720.0,           # y^6
    1.0 / 24.0,             # y^4
    -0.5,                   # y^2
    1.0,                    # y^0
)


def _fmix32(h):
    """MurmurHash3 finalizer: bijective int32 avalanche mixer (wraparound mul)."""
    h = h ^ lax.shift_right_logical(h, 16)
    h = h * jnp.int32(_M1)
    h = h ^ lax.shift_right_logical(h, 13)
    h = h * jnp.int32(_M2)
    h = h ^ lax.shift_right_logical(h, 16)
    return h


def _bits_to_unit(h, lo_open):
    """Top 24 bits of an int32 hash -> f32 uniform. lo_open=True -> (0,1], else [0,1)."""
    b = lax.shift_right_logical(h, 8).astype(jnp.float32)
    if lo_open:
        b = b + 1.0
    return b * (1.0 / 16777216.0)


def _cos_poly(y):
    """cos(y) for y in [-pi, pi] via even polynomial (VPU-only, no trig op needed)."""
    q = y * y
    acc = _COS_COEFFS[0]
    for c in _COS_COEFFS[1:]:
        acc = acc * q + c
    return acc


def _gaussian_noise_kernel(seed_ref, x_ref, o_ref, *, sigma, block_rows, width):
    i = pl.program_id(0)

    # Unique per-element counter: global flat index of each element in this tile.
    row = lax.broadcasted_iota(jnp.int32, (block_rows, width), 0)
    col = lax.broadcasted_iota(jnp.int32, (block_rows, width), 1)
    ctr = (i * block_rows + row) * width + col

    seed = seed_ref[0]
    base = ctr ^ seed
    h1 = _fmix32(base)
    h2 = _fmix32(base + jnp.int32(_GOLDEN))

    u1 = _bits_to_unit(h1, lo_open=True)    # (0, 1]  -> log() is safe
    u2 = _bits_to_unit(h2, lo_open=False)   # [0, 1)

    # Box-Muller: z = sqrt(-2 ln u1) * cos(2 pi u2)
    r = jnp.sqrt(-2.0 * jnp.log(u1))
    y = (2.0 * math.pi) * (u2 - 0.5)        # in [-pi, pi)
    z = r * (-_cos_poly(y))                 # cos(2 pi u2) = -cos(2 pi (u2 - 0.5))

    xf = x_ref[...].astype(jnp.float32)
    o_ref[...] = (xf * (1.0 + sigma * z)).astype(o_ref.dtype)


def _choose_width(n):
    """Largest multiple-of-128 divisor of n, capped at _MAX_WIDTH (0 if none)."""
    best = 0
    w = _LANE
    cap = min(n, _MAX_WIDTH)
    while w <= cap:
        if n % w == 0:
            best = w
        w += _LANE
    return best


def gaussian_noise(x, seed, sigma=SIGMA, training=True):
    """Forward pass of GaussianNoise: x + sigma * x * N(0,1) when training."""
    if (not training) or sigma == 0.0:
        return x

    orig_shape = x.shape
    dtype = x.dtype
    flat = x.reshape(-1)                     # native dtype, no up-cast
    n = flat.shape[0]

    width = _choose_width(n)
    if width == 0:
        # TODO(synk): handle ragged tails with a masked store instead of padding.
        pad = (-n) % _LANE
        flat = jnp.pad(flat, (0, pad))
        width = _choose_width(n + pad)
    n_pad = flat.shape[0]
    rows = n_pad // width
    mat = flat.reshape(rows, width)          # lane-dense wide slab

    itemsize = jnp.dtype(dtype).itemsize
    if rows <= 8:
        block_rows = rows                    # block == full extent (allowed)
    else:
        cap = max(8, (_TARGET_BLOCK_BYTES // (width * itemsize)) // 8 * 8)
        block_rows = int(min(cap, (rows // 8) * 8))
    grid = (pl.cdiv(rows, block_rows),)

    seed_arr = jnp.asarray([seed], dtype=jnp.int32)

    kernel = functools.partial(
        _gaussian_noise_kernel,
        sigma=float(sigma), block_rows=block_rows, width=width)

    out = pl.pallas_call(
        kernel,
        out_shape=jax.ShapeDtypeStruct((rows, width), dtype),
        grid_spec=pltpu.PrefetchScalarGridSpec(
            num_scalar_prefetch=1,           # seed lands in SMEM
            grid=grid,
            in_specs=[pl.BlockSpec((block_rows, width), lambda i, seed: (i, 0))],
            out_specs=pl.BlockSpec((block_rows, width), lambda i, seed: (i, 0)),
        ),
        compiler_params=pltpu.CompilerParams(
            dimension_semantics=("parallel",)),
    )(seed_arr, mat)

    out = out.reshape(-1)
    if n_pad != n:
        out = out[:n]
    return out.reshape(orig_shape)


if __name__ == "__main__":
    key = jax.random.PRNGKey(0)
    # Small NCHW-style input consistent with the module's usage.
    x = jax.random.normal(key, (2, 4, 16, 16), dtype=jnp.float32)

    y = jax.block_until_ready(gaussian_noise(x, seed=1234, sigma=SIGMA, training=True))

    # Shape / dtype preserved, noise actually added, values finite.
    assert y.shape == x.shape and y.dtype == x.dtype
    assert bool(jnp.all(jnp.isfinite(y)))
    assert not bool(jnp.allclose(y, x))

    # Implied relative noise (y/x - 1)/sigma should look roughly N(0, 1).
    mask = jnp.abs(x) > 1e-6
    cnt = jnp.sum(mask)
    z = jnp.where(mask, (y / x - 1.0) / SIGMA, 0.0)
    z_mean = float(jnp.sum(z) / cnt)
    z_std = float(jnp.sqrt(jnp.sum(jnp.where(mask, (z - z_mean) ** 2, 0.0)) / cnt))
    assert abs(z_mean) < 0.3 and 0.5 < z_std < 1.5, (z_mean, z_std)

    # Eval mode / sigma == 0 must be identity.
    y_eval = jax.block_until_ready(gaussian_noise(x, seed=1234, training=False))
    assert bool(jnp.array_equal(y_eval, x))

    print("KERNEL_OK")
</pallas_src>

<mosaic_0001>
module attributes {stable_mosaic.version = 11 : i64} {
  func.func @_gaussian_noise_kernel(%arg0: i32, %arg1: memref<1xi32, #tpu.memory_space<smem>>, %arg2: memref<1x2048xf32, #tpu.memory_space<vmem>>, %arg3: memref<1x2048xf32, #tpu.memory_space<vmem>>) attributes {dimension_semantics = [#tpu.dimension_semantics<parallel>], iteration_bounds = array<i64: 1>, scalar_prefetch = 1 : i64, scratch_operands = 0 : i64, tpu.core_type = #tpu.core_type<tc>, window_params = [{transform_indices = @transform_0, window_bounds = array<i64: 1, 2048>}, {transform_indices = @transform_1, window_bounds = array<i64: 1, 2048>}]} {
    %0 = tpu.iota {dimensions = array<i32: 0>} : vector<1x2048xi32>
    %1 = tpu.iota {dimensions = array<i32: 1>} : vector<1x2048xi32>
    %c1_i32 = arith.constant 1 : i32
    %2 = arith.muli %arg0, %c1_i32 : i32
    %3 = vector.broadcast %2 : i32 to vector<1x2048xi32>
    %4 = arith.addi %3, %0 : vector<1x2048xi32>
    %c2048_i32 = arith.constant 2048 : i32
    %5 = vector.broadcast %c2048_i32 : i32 to vector<1x2048xi32>
    %6 = arith.muli %4, %5 : vector<1x2048xi32>
    %7 = arith.addi %6, %1 : vector<1x2048xi32>
    %c0 = arith.constant 0 : index
    %8 = memref.load %arg1[%c0] : memref<1xi32, #tpu.memory_space<smem>>
    %9 = vector.broadcast %8 : i32 to vector<1x2048xi32>
    %10 = arith.xori %7, %9 : vector<1x2048xi32>
    %c16_i32 = arith.constant 16 : i32
    %11 = vector.broadcast %c16_i32 : i32 to vector<1x2048xi32>
    %12 = arith.shrui %10, %11 : vector<1x2048xi32>
    %13 = arith.xori %10, %12 : vector<1x2048xi32>
    %c-2048144789_i32 = arith.constant -2048144789 : i32
    %14 = vector.broadcast %c-2048144789_i32 : i32 to vector<1x2048xi32>
    %15 = arith.muli %13, %14 : vector<1x2048xi32>
    %c13_i32 = arith.constant 13 : i32
    %16 = vector.broadcast %c13_i32 : i32 to vector<1x2048xi32>
    %17 = arith.shrui %15, %16 : vector<1x2048xi32>
    %18 = arith.xori %15, %17 : vector<1x2048xi32>
    %c-1028477387_i32 = arith.constant -1028477387 : i32
    %19 = vector.broadcast %c-1028477387_i32 : i32 to vector<1x2048xi32>
    %20 = arith.muli %18, %19 : vector<1x2048xi32>
    %c16_i32_0 = arith.constant 16 : i32
    %21 = vector.broadcast %c16_i32_0 : i32 to vector<1x2048xi32>
    %22 = arith.shrui %20, %21 : vector<1x2048xi32>
    %23 = arith.xori %20, %22 : vector<1x2048xi32>
    %c-1640531527_i32 = arith.constant -1640531527 : i32
    %24 = vector.broadcast %c-1640531527_i32 : i32 to vector<1x2048xi32>
    %25 = arith.addi %10, %24 : vector<1x2048xi32>
    %c16_i32_1 = arith.constant 16 : i32
    %26 = vector.broadcast %c16_i32_1 : i32 to vector<1x2048xi32>
    %27 = arith.shrui %25, %26 : vector<1x2048xi32>
    %28 = arith.xori %25, %27 : vector<1x2048xi32>
    %c-2048144789_i32_2 = arith.constant -2048144789 : i32
    %29 = vector.broadcast %c-2048144789_i32_2 : i32 to vector<1x2048xi32>
    %30 = arith.muli %28, %29 : vector<1x2048xi32>
    %c13_i32_3 = arith.constant 13 : i32
    %31 = vector.broadcast %c13_i32_3 : i32 to vector<1x2048xi32>
    %32 = arith.shrui %30, %31 : vector<1x2048xi32>
    %33 = arith.xori %30, %32 : vector<1x2048xi32>
    %c-1028477387_i32_4 = arith.constant -1028477387 : i32
    %34 = vector.broadcast %c-1028477387_i32_4 : i32 to vector<1x2048xi32>
    %35 = arith.muli %33, %34 : vector<1x2048xi32>
    %c16_i32_5 = arith.constant 16 : i32
    %36 = vector.broadcast %c16_i32_5 : i32 to vector<1x2048xi32>
    %37 = arith.shrui %35, %36 : vector<1x2048xi32>
    %38 = arith.xori %35, %37 : vector<1x2048xi32>
    %c8_i32 = arith.constant 8 : i32
    %39 = vector.broadcast %c8_i32 : i32 to vector<1x2048xi32>
    %40 = arith.shrui %23, %39 : vector<1x2048xi32>
    %41 = arith.sitofp %40 : vector<1x2048xi32> to vector<1x2048xf32>
    %cst = arith.constant 1.000000e+00 : f32
    %42 = vector.broadcast %cst : f32 to vector<1x2048xf32>
    %43 = arith.addf %41, %42 : vector<1x2048xf32>
    %cst_6 = arith.constant 5.96046448E-8 : f32
    %44 = vector.broadcast %cst_6 : f32 to vector<1x2048xf32>
    %45 = arith.mulf %43, %44 : vector<1x2048xf32>
    %c8_i32_7 = arith.constant 8 : i32
    %46 = vector.broadcast %c8_i32_7 : i32 to vector<1x2048xi32>
    %47 = arith.shrui %38, %46 : vector<1x2048xi32>
    %48 = arith.sitofp %47 : vector<1x2048xi32> to vector<1x2048xf32>
    %cst_8 = arith.constant 5.96046448E-8 : f32
    %49 = vector.broadcast %cst_8 : f32 to vector<1x2048xf32>
    %50 = arith.mulf %48, %49 : vector<1x2048xf32>
    %51 = math.log %45 : vector<1x2048xf32>
    %cst_9 = arith.constant -2.000000e+00 : f32
    %52 = vector.broadcast %cst_9 : f32 to vector<1x2048xf32>
    %53 = arith.mulf %52, %51 : vector<1x2048xf32>
    %54 = math.sqrt %53 : vector<1x2048xf32>
    %cst_10 = arith.constant 5.000000e-01 : f32
    %55 = vector.broadcast %cst_10 : f32 to vector<1x2048xf32>
    %56 = arith.subf %50, %55 : vector<1x2048xf32>
    %cst_11 = arith.constant 6.28318548 : f32
    %57 = vector.broadcast %cst_11 : f32 to vector<1x2048xf32>
    %58 = arith.mulf %57, %56 : vector<1x2048xf32>
    %59 = arith.mulf %58, %58 : vector<1x2048xf32>
    %cst_12 = arith.constant -1.14707454E-11 : f32
    %60 = vector.broadcast %cst_12 : f32 to vector<1x2048xf32>
    %61 = arith.mulf %60, %59 : vector<1x2048xf32>
    %cst_13 = arith.constant 2.08767559E-9 : f32
    %62 = vector.broadcast %cst_13 : f32 to vector<1x2048xf32>
    %63 = arith.addf %61, %62 : vector<1x2048xf32>
    %64 = arith.mulf %63, %59 : vector<1x2048xf32>
    %cst_14 = arith.constant -2.755732E-7 : f32
    %65 = vector.broadcast %cst_14 : f32 to vector<1x2048xf32>
    %66 = arith.addf %64, %65 : vector<1x2048xf32>
    %67 = arith.mulf %66, %59 : vector<1x2048xf32>
    %cst_15 = arith.constant 2.48015876E-5 : f32
    %68 = vector.broadcast %cst_15 : f32 to vector<1x2048xf32>
    %69 = arith.addf %67, %68 : vector<1x2048xf32>
    %70 = arith.mulf %69, %59 : vector<1x2048xf32>
    %cst_16 = arith.constant -0.00138888892 : f32
    %71 = vector.broadcast %cst_16 : f32 to vector<1x2048xf32>
    %72 = arith.addf %70, %71 : vector<1x2048xf32>
    %73 = arith.mulf %72, %59 : vector<1x2048xf32>
    %cst_17 = arith.constant 0.0416666679 : f32
    %74 = vector.broadcast %cst_17 : f32 to vector<1x2048xf32>
    %75 = arith.addf %73, %74 : vector<1x2048xf32>
    %76 = arith.mulf %75, %59 : vector<1x2048xf32>
    %cst_18 = arith.constant -5.000000e-01 : f32
    %77 = vector.broadcast %cst_18 : f32 to vector<1x2048xf32>
    %78 = arith.addf %76, %77 : vector<1x2048xf32>
    %79 = arith.mulf %78, %59 : vector<1x2048xf32>
    %cst_19 = arith.constant 1.000000e+00 : f32
    %80 = vector.broadcast %cst_19 : f32 to vector<1x2048xf32>
    %81 = arith.addf %79, %80 : vector<1x2048xf32>
    %cst_20 = arith.constant 0.000000e+00 : f32
    %82 = vector.broadcast %cst_20 : f32 to vector<1x2048xf32>
    %83 = arith.subf %82, %81 : vector<1x2048xf32>
    %84 = arith.mulf %54, %83 : vector<1x2048xf32>
    %c0_21 = arith.constant 0 : index
    %c0_22 = arith.constant 0 : index
    %85 = vector.load %arg2[%c0_21, %c0_22] : memref<1x2048xf32, #tpu.memory_space<vmem>>, vector<1x2048xf32>
    %cst_23 = arith.constant 1.000000e-01 : f32
    %86 = vector.broadcast %cst_23 : f32 to vector<1x2048xf32>
    %87 = arith.mulf %86, %84 : vector<1x2048xf32>
    %cst_24 = arith.constant 1.000000e+00 : f32
    %88 = vector.broadcast %cst_24 : f32 to vector<1x2048xf32>
    %89 = arith.addf %88, %87 : vector<1x2048xf32>
    %90 = arith.mulf %85, %89 : vector<1x2048xf32>
    %c0_25 = arith.constant 0 : index
    %c0_26 = arith.constant 0 : index
    %91 = vector.load %arg3[%c0_25, %c0_26] : memref<1x2048xf32, #tpu.memory_space<vmem>>, vector<1x2048xf32>
    tpu.vector_store %arg3[%c0_25, %c0_26], %90 {strides = array<i32>} : memref<1x2048xf32, #tpu.memory_space<vmem>>, vector<1x2048xf32>,
    return
  }
  func.func @transform_0(%arg0: i32, %arg1: memref<1xi32, #tpu.memory_space<smem>>) -> (i32, i32) {
    %c0_i32 = arith.constant 0 : i32
    %c0_i32_0 = arith.constant 0 : i32
    return %arg0, %c0_i32 : i32, i32
  }
  func.func @transform_1(%arg0: i32, %arg1: memref<1xi32, #tpu.memory_space<smem>>) -> (i32, i32) {
    %c0_i32 = arith.constant 0 : i32
    %c0_i32_0 = arith.constant 0 : i32
    return %arg0, %c0_i32 : i32, i32
  }
}

</mosaic_0001>

<bundles_post_ra>
// kernel: tpu_custom_call.1
= control target key start
LH: loop header
LB: loop body
LE: loop exit
PB: predicated region body
PF: predicated region fallthrough
CT: control target
= control target key end

     0   :  { %8 = vsyncpa [#allocation5], 0  ;;  %s1927_s0 = inlined_call_operand.<no memory space> [shape: s32[1], index: 0, kind: input, shape index: {}]   ;;  %s1928_s1 = inlined_call_operand.hbm [shape: f32[1,2048], index: 1, kind: input, shape index: {}]   ;;  %s1929_s2 = inlined_call_operand.hbm [shape: f32[1,2048], index: 2, kind: output, shape index: {}]  }
   0x1   :  { %9 = vsyncpa [#allocation6], 0  ;;  %s1227_s9 = smov [#allocation4]   ;;  %s1179_s13 = scalar_lea.hbm %s1928_s1, 256 }
   0x2   :  { %s16_s10 = sshll.u32 %s1227_s9, 4  ;;  %p1180_p0 = scmp.ne.s32.totalorder %s1928_s1, %s1179_s13  ;;  %s17_s10 = int_to_ptr.vmem [resolvable:$true] %s16_s10 }
   0x3   :  { %p1183_p1 = scmp.lt.u32.totalorder %s1179_s13, %s1928_s1 }
   0x5   :  { %p1185_p2 = pnand %p1183_p1, %p1180_p0 }
   0x7   :  { %1188 = shalt.err (!%p1185_p2)
}
   0x8   :  { %s1189_s18 = scalar_lea.vmem %s17_s10, 256  ;;  %p1194_p4 = scmp.lt.s32.totalorder %s17_s10, %s17_s10 }
   0x9   :  { %p1190_p3 = scmp.ne.s32.totalorder %s17_s10, %s1189_s18  ;;  %p1195_p5 = scmp.lt.s32.totalorder %s1189_s18, %s1189_s18 }
   0xb   :  { %p1196_p6 = por %p1195_p5, %p1194_p4 }
   0xd   :  { %p1197_p7 = pnand %p1196_p6, %p1190_p3 }
   0xf   :  { %1200 = shalt.err (!%p1197_p7)
}
  0x10   :  { %19 = dma.hbm_to_vmem [thread:$0]  %s1928_s1, 256, %s17_s10, [#allocation5]  }
  0x11   :  { %1223 = dma.done.wait [#allocation5], 256  }
  0x12   :  { %1224 = vsyncadd [#allocation5], 4294967040  ;;  %v23_v0 = vlaneseq  ;;  %v62_v5 = vstv %s1927_s0  ;;  %s1229_s0 = smov [#allocation7]  }
  0x13   :  { %s1087_s1 = sshll.u32 %s1229_s0, 4  ;;  %s1088_s1 = int_to_ptr.vmem [resolvable:$true] %s1087_s1 }
  0x14   :  { %v1257_v1 = vshrl.u32 %v23_v0, 7  ;;  %v26_v2 = vand.u32 127, %v23_v0  ;;  %s1201_s23 = scalar_lea.vmem %s1088_s1, 256  ;;  %p1206_p9 = scmp.lt.s32.totalorder %s1088_s1, %s1088_s1 }
  0x15   :  { %p1202_p8 = scmp.ne.s32.totalorder %s1088_s1, %s1201_s23  ;;  %p1207_p10 = scmp.lt.s32.totalorder %s1201_s23, %s1201_s23 }
  0x16   :  { %1931 = vst [vmem:[#allocation10_spill] sm:$0xff] %v1257_v1  ;;  %v27_v3 = vadd.s32 128, %v26_v2  ;;  %v44_v4 = vmul.u32 2048, %v1257_v1  ;;  %v28_v6 = vadd.s32 256, %v26_v2  ;;  %v29_v7 = vadd.s32 384, %v26_v2 }
  0x17   :  { %v30_v8 = vadd.s32 512, %v26_v2  ;;  %v31_v9 = vadd.s32 640, %v26_v2  ;;  %v32_v10 = vadd.s32 768, %v26_v2  ;;  %v33_v11 = vadd.s32 896, %v26_v2  ;;  %p1208_p11 = por %p1207_p10, %p1206_p9 }
  0x18   :  { %v34_v12 = vadd.s32 1024, %v26_v2  ;;  %v35_v13 = vadd.s32 1152, %v26_v2  ;;  %v36_v14 = vadd.s32 1280, %v26_v2  ;;  %v37_v15 = vadd.s32 1408, %v26_v2 }
  0x19   :  { %v38_v16 = vadd.s32 1536, %v26_v2  ;;  %v39_v17 = vadd.s32 1664, %v26_v2  ;;  %v40_v18 = vadd.s32 1792, %v26_v2  ;;  %v41_v19 = vadd.s32 1920, %v26_v2  ;;  %p1209_p12 = pnand %p1208_p11, %p1202_p8 }
  0x1a   :  { %v45_v20 = vadd.s32 %v44_v4, %v26_v2  ;;  %v46_v21 = vadd.s32 %v44_v4, %v27_v3  ;;  %v47_v22 = vadd.s32 %v44_v4, %v28_v6  ;;  %v48_v23 = vadd.s32 %v44_v4, %v29_v7 }
  0x1b   :  { %v49_v24 = vadd.s32 %v44_v4, %v30_v8  ;;  %v50_v25 = vadd.s32 %v44_v4, %v31_v9  ;;  %v51_v26 = vadd.s32 %v44_v4, %v32_v10  ;;  %v52_v27 = vadd.s32 %v44_v4, %v33_v11 }
  0x1c   :  { %v53_v28 = vadd.s32 %v44_v4, %v34_v12  ;;  %v54_v29 = vadd.s32 %v44_v4, %v35_v13  ;;  %v55_v30 = vadd.s32 %v44_v4, %v36_v14  ;;  %v56_v31 = vadd.s32 %v44_v4, %v37_v15 }
  0x1d   :  { %v57_v32 = vadd.s32 %v44_v4, %v38_v16  ;;  %v58_v33 = vadd.s32 %v44_v4, %v39_v17  ;;  %v59_v34 = vadd.s32 %v44_v4, %v40_v18  ;;  %v60_v35 = vadd.s32 %v44_v4, %v41_v19 }
  0x1e   :  { %v63_v36 = vxor.u32 %v62_v5, %v45_v20  ;;  %v64_v37 = vxor.u32 %v62_v5, %v46_v21  ;;  %v1263_v38 = vxor.u32 %v62_v5, %v47_v22  ;;  %v1265_v39 = vxor.u32 %v62_v5, %v48_v23 }
  0x1f   :  { %v1267_v40 = vxor.u32 %v62_v5, %v49_v24  ;;  %v1269_v41 = vxor.u32 %v62_v5, %v50_v25  ;;  %v1271_v42 = vxor.u32 %v62_v5, %v51_v26  ;;  %v1273_v43 = vxor.u32 %v62_v5, %v52_v27 }
  0x20   :  { %v1275_v44 = vxor.u32 %v62_v5, %v53_v28  ;;  %v1277_v45 = vxor.u32 %v62_v5, %v54_v29  ;;  %v1279_v46 = vxor.u32 %v62_v5, %v55_v30  ;;  %v1281_v47 = vxor.u32 %v62_v5, %v56_v31 }
  0x21   :  { %v79_v48 = vshrl.u32 %v63_v36, 16  ;;  %v80_v49 = vshrl.u32 %v64_v37, 16  ;;  %v1283_v50 = vxor.u32 %v62_v5, %v57_v32  ;;  %v1285_v51 = vxor.u32 %v62_v5, %v58_v33 }
  0x22   :  { %v81_v52 = vshrl.u32 %v1263_v38, 16  ;;  %v82_v53 = vshrl.u32 %v1265_v39, 16  ;;  %v1289_v54 = vxor.u32 %v62_v5, %v59_v34  ;;  %v1291_v55 = vxor.u32 %v62_v5, %v60_v35 }
  0x23   :  { %v83_v56 = vshrl.u32 %v1267_v40, 16  ;;  %v84_v57 = vshrl.u32 %v1269_v41, 16  ;;  %v85_v58 = vshrl.u32 %v1271_v42, 16  ;;  %v86_v59 = vshrl.u32 %v1273_v43, 16 }
  0x24   :  { %v87_v60 = vshrl.u32 %v1275_v44, 16  ;;  %v88_v61 = vshrl.u32 %v1277_v45, 16  ;;  %v89_v62 = vshrl.u32 %v1279_v46, 16  ;;  %v90_v63 = vshrl.u32 %v1281_v47, 16 }
  0x25   :  { %v95_v0 = vxor.u32 %v79_v48, %v63_v36  ;;  %v96_v2 = vxor.u32 %v80_v49, %v64_v37  ;;  %v91_v3 = vshrl.u32 %v1283_v50, 16  ;;  %v92_v4 = vshrl.u32 %v1285_v51, 16 }
  0x26   :  { %v97_v5 = vxor.u32 %v81_v52, %v1263_v38  ;;  %v98_v6 = vxor.u32 %v82_v53, %v1265_v39  ;;  %v93_v7 = vshrl.u32 %v1289_v54, 16  ;;  %v94_v8 = vshrl.u32 %v1291_v55, 16 }
  0x27   :  { %v99_v9 = vxor.u32 %v83_v56, %v1267_v40  ;;  %v100_v10 = vxor.u32 %v84_v57, %v1269_v41  ;;  %v101_v11 = vxor.u32 %v85_v58, %v1271_v42  ;;  %v102_v12 = vxor.u32 %v86_v59, %v1273_v43 }
  0x28   :  { %v103_v13 = vxor.u32 %v87_v60, %v1275_v44  ;;  %v104_v14 = vxor.u32 %v88_v61, %v1277_v45  ;;  %v105_v15 = vxor.u32 %v89_v62, %v1279_v46  ;;  %v106_v16 = vxor.u32 %v90_v63, %v1281_v47 }
  0x29   :  { %v111_v17 = vmul.u32 2246822507, %v95_v0  ;;  %v112_v18 = vmul.u32 2246822507, %v96_v2  ;;  %v107_v19 = vxor.u32 %v91_v3, %v1283_v50  ;;  %v108_v20 = vxor.u32 %v92_v4, %v1285_v51 }
  0x2a   :  { %v113_v21 = vmul.u32 2246822507, %v97_v5  ;;  %v114_v22 = vmul.u32 2246822507, %v98_v6  ;;  %v109_v23 = vxor.u32 %v93_v7, %v1289_v54  ;;  %v1318_v26 = vadd.s32 2654435769, %v63_v36 }
  0x2b   :  { %v115_v24 = vmul.u32 2246822507, %v99_v9  ;;  %v116_v25 = vmul.u32 2246822507, %v100_v10  ;;  %v110_v27 = vxor.u32 %v94_v8, %v1291_v55  ;;  %v1321_v30 = vadd.s32 2654435769, %v64_v37 }
  0x2c   :  { %v117_v28 = vmul.u32 2246822507, %v101_v11  ;;  %v118_v29 = vmul.u32 2246822507, %v102_v12  ;;  %v127_v33 = vshrl.u32 %v111_v17, 13  ;;  %v128_v34 = vshrl.u32 %v112_v18, 13 }
  0x2d   :  { %v119_v31 = vmul.u32 2246822507, %v103_v13  ;;  %v120_v32 = vmul.u32 2246822507, %v104_v14  ;;  %v129_v49 = vshrl.u32 %v113_v21, 13  ;;  %v130_v52 = vshrl.u32 %v114_v22, 13 }
  0x2e   :  { %v121_v35 = vmul.u32 2246822507, %v105_v15  ;;  %v122_v48 = vmul.u32 2246822507, %v106_v16  ;;  %v131_v57 = vshrl.u32 %v115_v24, 13  ;;  %v132_v58 = vshrl.u32 %v116_v25, 13 }
  0x2f   :  { %v123_v53 = vmul.u32 2246822507, %v107_v19  ;;  %v124_v56 = vmul.u32 2246822507, %v108_v20  ;;  %v133_v60 = vshrl.u32 %v117_v28, 13  ;;  %v134_v61 = vshrl.u32 %v118_v29, 13 }
  0x30   :  { %v125_v36 = vmul.u32 2246822507, %v109_v23  ;;  %v126_v59 = vmul.u32 2246822507, %v110_v27  ;;  %v135_v62 = vshrl.u32 %v119_v31, 13  ;;  %v136_v63 = vshrl.u32 %v120_v32, 13 }
  0x31   :  { %v143_v37 = vxor.u32 %v127_v33, %v111_v17  ;;  %v144_v0 = vxor.u32 %v128_v34, %v112_v18  ;;  %v137_v2 = vshrl.u32 %v121_v35, 13  ;;  %v138_v3 = vshrl.u32 %v122_v48, 13 }
  0x32   :  { %v145_v4 = vxor.u32 %v129_v49, %v113_v21  ;;  %v146_v5 = vxor.u32 %v130_v52, %v114_v22  ;;  %v139_v6 = vshrl.u32 %v123_v53, 13  ;;  %v140_v7 = vshrl.u32 %v124_v56, 13 }
  0x33   :  { %v147_v8 = vxor.u32 %v131_v57, %v115_v24  ;;  %v148_v9 = vxor.u32 %v132_v58, %v116_v25  ;;  %v141_v10 = vshrl.u32 %v125_v36, 13  ;;  %v142_v11 = vshrl.u32 %v126_v59, 13 }
  0x34   :  { %v149_v12 = vxor.u32 %v133_v60, %v117_v28  ;;  %v150_v13 = vxor.u32 %v134_v61, %v118_v29  ;;  %v151_v14 = vxor.u32 %v135_v62, %v119_v31  ;;  %v152_v15 = vxor.u32 %v136_v63, %v120_v32 }
  0x35   :  { %v159_v16 = vmul.u32 3266489909, %v143_v37  ;;  %v160_v19 = vmul.u32 3266489909, %v144_v0  ;;  %v153_v20 = vxor.u32 %v137_v2, %v121_v35  ;;  %v154_v23 = vxor.u32 %v138_v3, %v122_v48 }
  0x36   :  { %v161_v17 = vmul.u32 3266489909, %v145_v4  ;;  %v162_v18 = vmul.u32 3266489909, %v146_v5  ;;  %v155_v27 = vxor.u32 %v139_v6, %v123_v53  ;;  %v156_v33 = vxor.u32 %v140_v7, %v124_v56 }
  0x37   :  { %v163_v21 = vmul.u32 3266489909, %v147_v8  ;;  %v164_v22 = vmul.u32 3266489909, %v148_v9  ;;  %v157_v34 = vxor.u32 %v141_v10, %v125_v36  ;;  %v158_v49 = vxor.u32 %v142_v11, %v126_v59 }
  0x38   :  { %v165_v24 = vmul.u32 3266489909, %v149_v12  ;;  %v166_v25 = vmul.u32 3266489909, %v150_v13  ;;  %v1324_v28 = vadd.s32 2654435769, %v1263_v38 }
  0x39   :  { %v167_v52 = vmul.u32 3266489909, %v151_v14  ;;  %v168_v57 = vmul.u32 3266489909, %v152_v15  ;;  %v1327_v32 = vadd.s32 2654435769, %v1265_v39 }
  0x3a   :  { %v169_v29 = vmul.u32 3266489909, %v153_v20  ;;  %v170_v31 = vmul.u32 3266489909, %v154_v23  ;;  %v175_v53 = vshrl.u32 %v159_v16, 16  ;;  %v176_v56 = vshrl.u32 %v160_v19, 16 }
  0x3b   :  { %v171_v35 = vmul.u32 3266489909, %v155_v27  ;;  %v172_v48 = vmul.u32 3266489909, %v156_v33  ;;  %v177_v36 = vshrl.u32 %v161_v17, 16  ;;  %v178_v59 = vshrl.u32 %v162_v18, 16 }
  0x3c   :  { %v173_v58 = vmul.u32 3266489909, %v157_v34  ;;  %v174_v60 = vmul.u32 3266489909, %v158_v49  ;;  %v179_v61 = vshrl.u32 %v163_v21, 16  ;;  %v180_v62 = vshrl.u32 %v164_v22, 16 }
  0x3d   :  { %v181_v63 = vshrl.u32 %v165_v24, 16  ;;  %v182_v37 = vshrl.u32 %v166_v25, 16  ;;  %v183_v0 = vshrl.u32 %v167_v52, 16  ;;  %v184_v38 = vshrl.u32 %v168_v57, 16 }
  0x3e   :  { %v185_v2 = vshrl.u32 %v169_v29, 16  ;;  %v186_v3 = vshrl.u32 %v170_v31, 16  ;;  %v187_v4 = vshrl.u32 %v171_v35, 16  ;;  %v188_v5 = vshrl.u32 %v172_v48, 16 }
  0x3f   :  { %v1329_v39 = vxor.u32 %v175_v53, %v159_v16  ;;  %v1331_v6 = vxor.u32 %v176_v56, %v160_v19  ;;  %v189_v7 = vshrl.u32 %v173_v58, 16  ;;  %v190_v8 = vshrl.u32 %v174_v60, 16 }
  0x40   :  { %v1333_v9 = vxor.u32 %v177_v36, %v161_v17  ;;  %v1335_v10 = vxor.u32 %v178_v59, %v162_v18  ;;  %v1337_v11 = vxor.u32 %v179_v61, %v163_v21  ;;  %v1339_v12 = vxor.u32 %v180_v62, %v164_v22 }
  0x41   :  { %v1341_v13 = vxor.u32 %v181_v63, %v165_v24  ;;  %v1343_v14 = vxor.u32 %v182_v37, %v166_v25  ;;  %v1345_v15 = vxor.u32 %v183_v0, %v167_v52  ;;  %v1347_v16 = vxor.u32 %v184_v38, %v168_v57 }
  0x42   :  { %v1349_v19 = vxor.u32 %v185_v2, %v169_v29  ;;  %v1351_v20 = vxor.u32 %v186_v3, %v170_v31  ;;  %v1353_v23 = vxor.u32 %v187_v4, %v171_v35  ;;  %v1355_v17 = vxor.u32 %v188_v5, %v172_v48 }
  0x43   :  { %v211_v18 = vadd.s32 2654435769, %v1267_v40  ;;  %v212_v27 = vadd.s32 2654435769, %v1269_v41  ;;  %v1359_v33 = vxor.u32 %v189_v7, %v173_v58  ;;  %v1361_v21 = vxor.u32 %v190_v8, %v174_v60 }
  0x44   :  { %v213_v22 = vadd.s32 2654435769, %v1271_v42  ;;  %v214_v34 = vadd.s32 2654435769, %v1273_v43  ;;  %v215_v49 = vadd.s32 2654435769, %v1275_v44 }
  0x45   :  { %v216_v24 = vadd.s32 2654435769, %v1277_v45  ;;  %v223_v25 = vshrl.u32 %v1318_v26, 16  ;;  %v224_v52 = vshrl.u32 %v1321_v30, 16  ;;  %v217_v40 = vadd.s32 2654435769, %v1279_v46 }
  0x46   :  { %v218_v41 = vadd.s32 2654435769, %v1281_v47  ;;  %v225_v57 = vshrl.u32 %v1324_v28, 16  ;;  %v226_v29 = vshrl.u32 %v1327_v32, 16  ;;  %v219_v42 = vadd.s32 2654435769, %v1283_v50 }
  0x47   :  { %v220_v43 = vadd.s32 2654435769, %v1285_v51  ;;  %v227_v31 = vshrl.u32 %v211_v18, 16  ;;  %v228_v44 = vshrl.u32 %v212_v27, 16  ;;  %v221_v45 = vadd.s32 2654435769, %v1289_v54 }
  0x48   :  { %v222_v35 = vadd.s32 2654435769, %v1291_v55  ;;  %v229_v48 = vshrl.u32 %v213_v22, 16  ;;  %v230_v53 = vshrl.u32 %v214_v34, 16  ;;  %v231_v56 = vshrl.u32 %v215_v49, 16 }
  0x49   :  { %v232_v46 = vshrl.u32 %v216_v24, 16  ;;  %v239_v47 = vxor.u32 %v223_v25, %v1318_v26  ;;  %v240_v58 = vxor.u32 %v224_v52, %v1321_v30  ;;  %v233_v60 = vshrl.u32 %v217_v40, 16 }
  0x4a   :  { %v234_v36 = vshrl.u32 %v218_v41, 16  ;;  %v241_v50 = vxor.u32 %v225_v57, %v1324_v28  ;;  %v242_v51 = vxor.u32 %v226_v29, %v1327_v32  ;;  %v235_v59 = vshrl.u32 %v219_v42, 16 }
  0x4b   :  { %v236_v61 = vshrl.u32 %v220_v43, 16  ;;  %v243_v62 = vxor.u32 %v227_v31, %v211_v18  ;;  %v244_v54 = vxor.u32 %v228_v44, %v212_v27  ;;  %v237_v63 = vshrl.u32 %v221_v45, 16 }
  0x4c   :  { %v238_v55 = vshrl.u32 %v222_v35, 16  ;;  %v245_v37 = vxor.u32 %v229_v48, %v213_v22  ;;  %v246_v0 = vxor.u32 %v230_v53, %v214_v34  ;;  %v247_v38 = vxor.u32 %v231_v56, %v215_v49 }
  0x4d   :  { %v248_v2 = vxor.u32 %v232_v46, %v216_v24  ;;  %v255_v3 = vmul.u32 2246822507, %v239_v47  ;;  %v256_v26 = vmul.u32 2246822507, %v240_v58  ;;  %v249_v4 = vxor.u32 %v233_v60, %v217_v40 }
  0x4e   :  { %v250_v30 = vxor.u32 %v234_v36, %v218_v41  ;;  %v257_v5 = vmul.u32 2246822507, %v241_v50  ;;  %v258_v7 = vmul.u32 2246822507, %v242_v51  ;;  %v251_v8 = vxor.u32 %v235_v59, %v219_v42 }
  0x4f   :  { %v252_v28 = vxor.u32 %v236_v61, %v220_v43  ;;  %v259_v25 = vmul.u32 2246822507, %v243_v62  ;;  %v260_v32 = vmul.u32 2246822507, %v244_v54  ;;  %v253_v52 = vxor.u32 %v237_v63, %v221_v45 }
  0x50   :  { %v254_v57 = vxor.u32 %v238_v55, %v222_v35  ;;  %v261_v18 = vmul.u32 2246822507, %v245_v37  ;;  %v262_v27 = vmul.u32 2246822507, %v246_v0  ;;  %v271_v22 = vshrl.u32 %v255_v3, 13 }
  0x51   :  { %v263_v29 = vmul.u32 2246822507, %v247_v38  ;;  %v264_v31 = vmul.u32 2246822507, %v248_v2  ;;  %v272_v34 = vshrl.u32 %v256_v26, 13  ;;  %v273_v44 = vshrl.u32 %v257_v5, 13 }
  0x52   :  { %v265_v49 = vmul.u32 2246822507, %v249_v4  ;;  %v266_v24 = vmul.u32 2246822507, %v250_v30  ;;  %v274_v48 = vshrl.u32 %v258_v7, 13  ;;  %v275_v53 = vshrl.u32 %v259_v25, 13 }
  0x53   :  { %v267_v40 = vmul.u32 2246822507, %v251_v8  ;;  %v268_v41 = vmul.u32 2246822507, %v252_v28  ;;  %v276_v56 = vshrl.u32 %v260_v32, 13  ;;  %v277_v46 = vshrl.u32 %v261_v18, 13 }
  0x54   :  { %v269_v42 = vmul.u32 2246822507, %v253_v52  ;;  %v270_v43 = vmul.u32 2246822507, %v254_v57  ;;  %v278_v47 = vshrl.u32 %v262_v27, 13  ;;  %v279_v45 = vshrl.u32 %v263_v29, 13 }
  0x55   :  { %v280_v35 = vshrl.u32 %v264_v31, 13  ;;  %v1381_v58 = vxor.u32 %v271_v22, %v255_v3  ;;  %v1383_v60 = vxor.u32 %v272_v34, %v256_v26  ;;  %v281_v36 = vshrl.u32 %v265_v49, 13 }
  0x56   :  { %v282_v50 = vshrl.u32 %v266_v24, 13  ;;  %v289_v51 = vxor.u32 %v273_v44, %v257_v5  ;;  %v290_v59 = vxor.u32 %v274_v48, %v258_v7  ;;  %v283_v61 = vshrl.u32 %v267_v40, 13 }
  0x57   :  { %v284_v62 = vshrl.u32 %v268_v41, 13  ;;  %v291_v54 = vxor.u32 %v275_v53, %v259_v25  ;;  %v292_v63 = vxor.u32 %v276_v56, %v260_v32  ;;  %v285_v55 = vshrl.u32 %v269_v42, 13 }
  0x58   :  { %v286_v37 = vshrl.u32 %v270_v43, 13  ;;  %v293_v0 = vxor.u32 %v277_v46, %v261_v18  ;;  %v294_v38 = vxor.u32 %v278_v47, %v262_v27  ;;  %v295_v2 = vxor.u32 %v279_v45, %v263_v29 }
  0x59   :  { %v296_v4 = vxor.u32 %v280_v35, %v264_v31  ;;  %v303_v30 = vmul.u32 3266489909, %v1381_v58  ;;  %v304_v3 = vmul.u32 3266489909, %v1383_v60  ;;  %v297_v26 = vxor.u32 %v281_v36, %v265_v49 }
  0x5a   :  { %v298_v8 = vxor.u32 %v282_v50, %v266_v24  ;;  %v305_v28 = vmul.u32 3266489909, %v289_v51  ;;  %v306_v52 = vmul.u32 3266489909, %v290_v59  ;;  %v299_v5 = vxor.u32 %v283_v61, %v267_v40 }
  0x5b   :  { %v300_v7 = vxor.u32 %v284_v62, %v268_v41  ;;  %v307_v57 = vmul.u32 3266489909, %v291_v54  ;;  %v308_v22 = vmul.u32 3266489909, %v292_v63  ;;  %v301_v25 = vxor.u32 %v285_v55, %v269_v42 }
  0x5c   :  { %v302_v32 = vxor.u32 %v286_v37, %v270_v43  ;;  %v309_v34 = vmul.u32 3266489909, %v293_v0  ;;  %v310_v44 = vmul.u32 3266489909, %v294_v38  ;;  %v351_v29 = vshrl.u32 %v1329_v39, 8 }
  0x5d   :  { %v311_v18 = vmul.u32 3266489909, %v295_v2  ;;  %v312_v27 = vmul.u32 3266489909, %v296_v4  ;;  %v352_v31 = vshrl.u32 %v1331_v6, 8  ;;  %v353_v49 = vshrl.u32 %v1333_v9, 8 }
  0x5e   :  { %v313_v48 = vmul.u32 3266489909, %v297_v26  ;;  %v314_v53 = vmul.u32 3266489909, %v298_v8  ;;  %v354_v24 = vshrl.u32 %v1335_v10, 8  ;;  %v355_v56 = vshrl.u32 %v1337_v11, 8 }
  0x5f   :  { %v315_v40 = vmul.u32 3266489909, %v299_v5  ;;  %v316_v41 = vmul.u32 3266489909, %v300_v7  ;;  %v356_v42 = vshrl.u32 %v1339_v12, 8  ;;  %v357_v47 = vshrl.u32 %v1341_v13, 8 }
  0x60   :  { %v317_v43 = vmul.u32 3266489909, %v301_v25  ;;  %v318_v46 = vmul.u32 3266489909, %v302_v32  ;;  %v358_v39 = vshrl.u32 %v1343_v14, 8  ;;  %v319_v45 = vshrl.u32 %v303_v30, 16 }
  0x61   :  { %v320_v6 = vshrl.u32 %v304_v3, 16  ;;  %v321_v35 = vshrl.u32 %v305_v28, 16  ;;  %v322_v58 = vshrl.u32 %v306_v52, 16  ;;  %v323_v60 = vshrl.u32 %v307_v57, 16 }
  0x62   :  { %v324_v9 = vshrl.u32 %v308_v22, 16  ;;  %v325_v36 = vshrl.u32 %v309_v34, 16  ;;  %v326_v10 = vshrl.u32 %v310_v44, 16  ;;  %v327_v50 = vshrl.u32 %v311_v18, 16 }
  0x63   :  { %v328_v51 = vshrl.u32 %v312_v27, 16  ;;  %v329_v59 = vshrl.u32 %v313_v48, 16  ;;  %v330_v11 = vshrl.u32 %v314_v53, 16  ;;  %v331_v61 = vshrl.u32 %v315_v40, 16 }
  0x64   :  { %v332_v12 = vshrl.u32 %v316_v41, 16  ;;  %v333_v62 = vshrl.u32 %v317_v43, 16  ;;  %v334_v54 = vshrl.u32 %v318_v46, 16  ;;  %v1395_v63 = vxor.u32 %v319_v45, %v303_v30 }
  0x65   :  { %v1397_v13 = vxor.u32 %v320_v6, %v304_v3  ;;  %v1399_v14 = vxor.u32 %v321_v35, %v305_v28  ;;  %v1401_v55 = vxor.u32 %v322_v58, %v306_v52  ;;  %v1403_v37 = vxor.u32 %v323_v60, %v307_v57 }
  0x66   :  { %v1405_v0 = vxor.u32 %v324_v9, %v308_v22  ;;  %v1407_v38 = vxor.u32 %v325_v36, %v309_v34  ;;  %v1409_v2 = vxor.u32 %v326_v10, %v310_v44  ;;  %v1411_v4 = vxor.u32 %v327_v50, %v311_v18 }
  0x67   :  { %v1413_v26 = vxor.u32 %v328_v51, %v312_v27  ;;  %v1415_v30 = vxor.u32 %v329_v59, %v313_v48  ;;  %v1417_v3 = vxor.u32 %v330_v11, %v314_v53  ;;  %v1419_v8 = vxor.u32 %v331_v61, %v315_v40 }
  0x68   :  { %v1421_v28 = vxor.u32 %v332_v12, %v316_v41  ;;  %v1423_v52 = vxor.u32 %v333_v62, %v317_v43  ;;  %v1425_v5 = vxor.u32 %v334_v54, %v318_v46  ;;  %v359_v7 = vshrl.u32 %v1345_v15, 8 }
  0x69   :  { %v360_v57 = vshrl.u32 %v1347_v16, 8  ;;  %v361_v22 = vshrl.u32 %v1349_v19, 8  ;;  %v362_v25 = vshrl.u32 %v1351_v20, 8  ;;  %v363_v32 = vshrl.u32 %v1353_v23, 8 }
  0x6a   :  { %v364_v34 = vshrl.u32 %v1355_v17, 8  ;;  %v365_v44 = vshrl.u32 %v1359_v33, 8  ;;  %v366_v18 = vshrl.u32 %v1361_v21, 8  ;;  %v367_v27 = vcvt.s32.f32 %v351_v29 }
  0x6b   :  { %v368_v48 = vcvt.s32.f32 %v352_v31  ;;  %v369_v53 = vcvt.s32.f32 %v353_v49  ;;  %v370_v40 = vcvt.s32.f32 %v354_v24  ;;  %v371_v41 = vcvt.s32.f32 %v355_v56 }
  0x6c   :  { %v372_v15 = vcvt.s32.f32 %v356_v42  ;;  %v373_v43 = vcvt.s32.f32 %v357_v47  ;;  %v374_v16 = vcvt.s32.f32 %v358_v39  ;;  %v375_v46 = vcvt.s32.f32 %v359_v7 }
  0x6d   :  { %v376_v19 = vcvt.s32.f32 %v360_v57  ;;  %v377_v45 = vcvt.s32.f32 %v361_v22  ;;  %v378_v20 = vcvt.s32.f32 %v362_v25  ;;  %v379_v6 = vcvt.s32.f32 %v363_v32 }
  0x6e   :  { %v380_v23 = vcvt.s32.f32 %v364_v34  ;;  %v381_v35 = vcvt.s32.f32 %v365_v44  ;;  %v382_v17 = vcvt.s32.f32 %v366_v18  ;;  %v383_v58 = vadd.f32 1.0, %v367_v27 }
  0x6f   :  { %v384_v33 = vadd.f32 1.0, %v368_v48  ;;  %v385_v60 = vadd.f32 1.0, %v369_v53  ;;  %v386_v21 = vadd.f32 1.0, %v370_v40  ;;  %v387_v29 = vadd.f32 1.0, %v371_v41 }
  0x70   :  { %v388_v31 = vadd.f32 1.0, %v372_v15  ;;  %v389_v49 = vadd.f32 1.0, %v373_v43  ;;  %v390_v24 = vadd.f32 1.0, %v374_v16  ;;  %v391_v56 = vadd.f32 1.0, %v375_v46 }
  0x71   :  { %v392_v42 = vadd.f32 1.0, %v376_v19  ;;  %v393_v47 = vadd.f32 1.0, %v377_v45  ;;  %v394_v39 = vadd.f32 1.0, %v378_v20  ;;  %v395_v9 = vadd.f32 1.0, %v379_v6 }
  0x72   :  { %v396_v36 = vadd.f32 1.0, %v380_v23  ;;  %v397_v10 = vadd.f32 1.0, %v381_v35  ;;  %v398_v50 = vadd.f32 1.0, %v382_v17  ;;  %v399_v51 = vmul.f32 5.9604645e-08, %v383_v58 }
  0x73   :  { %v400_v59 = vmul.f32 5.9604645e-08, %v384_v33  ;;  %v401_v11 = vmul.f32 5.9604645e-08, %v385_v60  ;;  %v402_v61 = vmul.f32 5.9604645e-08, %v386_v21  ;;  %v403_v12 = vmul.f32 5.9604645e-08, %v387_v29 }
  0x74   :  { %v404_v62 = vmul.f32 5.9604645e-08, %v388_v31  ;;  %v1435_v54 = vmul.f32 5.9604645e-08, %v389_v49  ;;  %v1437_v7 = vmul.f32 5.9604645e-08, %v390_v24  ;;  %v1439_v57 = vmul.f32 5.9604645e-08, %v391_v56 }
  0x75   :  { %v1441_v22 = vmul.f32 5.9604645e-08, %v392_v42  ;;  %v1443_v25 = vmul.f32 5.9604645e-08, %v393_v47  ;;  %v1445_v32 = vmul.f32 5.9604645e-08, %v394_v39  ;;  %v1447_v34 = vmul.f32 5.9604645e-08, %v395_v9 }
  0x76   :  { %v1449_v44 = vmul.f32 5.9604645e-08, %v396_v36  ;;  %v1451_v18 = vmul.f32 5.9604645e-08, %v397_v10  ;;  %v1453_v27 = vmul.f32 5.9604645e-08, %v398_v50  ;;  %v415_v48 = vshrl.u32 %v1395_v63, 8 }
  0x77   :  { %v416_v53 = vshrl.u32 %v1397_v13, 8  ;;  %v417_v40 = vshrl.u32 %v1399_v14, 8  ;;  %v418_v41 = vshrl.u32 %v1401_v55, 8  ;;  %v419_v15 = vshrl.u32 %v1403_v37, 8 }
  0x78   :  { %v420_v43 = vshrl.u32 %v1405_v0, 8  ;;  %v421_v16 = vshrl.u32 %v1407_v38, 8  ;;  %v422_v46 = vshrl.u32 %v1409_v2, 8  ;;  %v423_v19 = vshrl.u32 %v1411_v4, 8 }
  0x79   :  { %v424_v45 = vshrl.u32 %v1413_v26, 8  ;;  %v425_v63 = vshrl.u32 %v1415_v30, 8  ;;  %v426_v13 = vshrl.u32 %v1417_v3, 8  ;;  %v427_v14 = vshrl.u32 %v1419_v8, 8 }
  0x7a   :  { %v428_v55 = vshrl.u32 %v1421_v28, 8  ;;  %v429_v37 = vshrl.u32 %v1423_v52, 8  ;;  %v430_v0 = vshrl.u32 %v1425_v5, 8  ;;  %v431_v20 = vcvt.s32.f32 %v415_v48 }
  0x7b   :  { %v432_v38 = vcvt.s32.f32 %v416_v53  ;;  %v433_v6 = vcvt.s32.f32 %v417_v40  ;;  %v434_v2 = vcvt.s32.f32 %v418_v41  ;;  %v435_v23 = vcvt.s32.f32 %v419_v15 }
  0x7c   :  { %v436_v4 = vcvt.s32.f32 %v420_v43  ;;  %v437_v35 = vcvt.s32.f32 %v421_v16  ;;  %v438_v26 = vcvt.s32.f32 %v422_v46  ;;  %v439_v17 = vcvt.s32.f32 %v423_v19 }
  0x7d   :  { %v440_v30 = vcvt.s32.f32 %v424_v45  ;;  %v441_v58 = vcvt.s32.f32 %v425_v63  ;;  %v442_v3 = vcvt.s32.f32 %v426_v13  ;;  %v443_v33 = vcvt.s32.f32 %v427_v14 }
  0x7e   :  { %v444_v8 = vcvt.s32.f32 %v428_v55  ;;  %v445_v60 = vcvt.s32.f32 %v429_v37  ;;  %1115 = vlog2.f32 %v399_v51  ;;  %v446_v28 = vcvt.s32.f32 %v430_v0 }
  0x7f   :  { %v447_v52 = vmul.f32 5.9604645e-08, %v431_v20  ;;  %v448_v21 = vmul.f32 5.9604645e-08, %v432_v38  ;;  %1117 = vlog2.f32 %v400_v59  ;;  %v449_v5 = vmul.f32 5.9604645e-08, %v433_v6 }
  0x80   :  { %v450_v29 = vmul.f32 5.9604645e-08, %v434_v2  ;;  %v451_v31 = vmul.f32 5.9604645e-08, %v435_v23  ;;  %1119 = vlog2.f32 %v401_v11  ;;  %v452_v49 = vmul.f32 5.9604645e-08, %v436_v4 }
  0x81   :  { %v453_v24 = vmul.f32 5.9604645e-08, %v437_v35  ;;  %v454_v56 = vmul.f32 5.9604645e-08, %v438_v26  ;;  %1121 = vlog2.f32 %v402_v61  ;;  %v455_v42 = vmul.f32 5.9604645e-08, %v439_v17 }
  0x82   :  { %v456_v47 = vmul.f32 5.9604645e-08, %v440_v30  ;;  %v457_v39 = vmul.f32 5.9604645e-08, %v441_v58  ;;  %1123 = vlog2.f32 %v403_v12  ;;  %v458_v9 = vmul.f32 5.9604645e-08, %v442_v3 }
  0x83   :  { %v459_v36 = vmul.f32 5.9604645e-08, %v443_v33  ;;  %v460_v10 = vmul.f32 5.9604645e-08, %v444_v8  ;;  %1125 = vlog2.f32 %v404_v62  ;;  %v461_v50 = vmul.f32 5.9604645e-08, %v445_v60 }
  0x84   :  { %v462_v51 = vmul.f32 5.9604645e-08, %v446_v28  ;;  %1127 = vlog2.f32 %v1435_v54  ;;  %v1096_v59 = vadd.f32 -0.5, %v447_v52  ;;  %v1097_v11 = vadd.f32 -0.5, %v448_v21 }
  0x85   :  { %1129 = vlog2.f32 %v1437_v7  ;;  %v1098_v48 = vadd.f32 -0.5, %v449_v5  ;;  %v1099_v53 = vadd.f32 -0.5, %v450_v29  ;;  %v1100_v61 = vadd.f32 -0.5, %v451_v31 }
  0x86   :  { %1131 = vlog2.f32 %v1439_v57  ;;  %v1101_v40 = vadd.f32 -0.5, %v452_v49  ;;  %v1102_v41 = vadd.f32 -0.5, %v453_v24  ;;  %v1103_v12 = vadd.f32 -0.5, %v454_v56 }
  0x87   :  { %1133 = vlog2.f32 %v1441_v22  ;;  %v1104_v15 = vadd.f32 -0.5, %v455_v42  ;;  %v1105_v62 = vadd.f32 -0.5, %v456_v47  ;;  %v1106_v54 = vadd.f32 -0.5, %v457_v39 }
  0x88   :  { %v1116_v43 = vpop.eup %1115  ;;  %1135 = vlog2.f32 %v1443_v25  ;;  %v1107_v16 = vadd.f32 -0.5, %v458_v9  ;;  %v1108_v46 = vadd.f32 -0.5, %v459_v36  ;;  %v1109_v45 = vadd.f32 -0.5, %v460_v10 }
  0x89   :  { %v1118_v7 = vpop.eup %1117  ;;  %v464_v19 = vmul.f32 0.6931472, %v1116_v43  ;;  %1137 = vlog2.f32 %v1445_v32  ;;  %v1110_v57 = vadd.f32 -0.5, %v461_v50  ;;  %v1111_v22 = vadd.f32 -0.5, %v462_v51 }
  0x8a   :  { %v1120_v63 = vpop.eup %1119  ;;  %v466_v13 = vmul.f32 0.6931472, %v1118_v7  ;;  %1139 = vlog2.f32 %v1447_v34  ;;  %v639_v14 = vmul.f32 6.2831855, %v1096_v59  ;;  %v640_v0 = vmul.f32 6.2831855, %v1097_v11 }
  0x8b   :  { %v1122_v55 = vpop.eup %1121  ;;  %v468_v37 = vmul.f32 0.6931472, %v1120_v63  ;;  %1141 = vlog2.f32 %v1449_v44  ;;  %v1479_v25 = vmul.f32 -2.0, %v464_v19  ;;  %v641_v6 = vmul.f32 6.2831855, %v1098_v48 }
  0x8c   :  { %v1124_v20 = vpop.eup %1123  ;;  %v470_v38 = vmul.f32 0.6931472, %v1122_v55  ;;  %1143 = vlog2.f32 %v1451_v18  ;;  %v1482_v32 = vmul.f32 -2.0, %v466_v13  ;;  %v642_v4 = vmul.f32 6.2831855, %v1099_v53 }
  0x8d   :  { %v1126_v2 = vpop.eup %1125  ;;  %v472_v23 = vmul.f32 0.6931472, %v1124_v20  ;;  %1145 = vlog2.f32 %v1453_v27  ;;  %v1485_v34 = vmul.f32 -2.0, %v468_v37  ;;  %v643_v44 = vmul.f32 6.2831855, %v1100_v61 }
  0x8e   :  { %v1128_v35 = vpop.eup %1127  ;;  %1147 = vrsqrt.f32 %v1479_v25  ;;  %v644_v26 = vmul.f32 6.2831855, %v1101_v40  ;;  %v645_v17 = vmul.f32 6.2831855, %v1102_v41  ;;  %v474_v58 = vmul.f32 0.6931472, %v1126_v2 }
  0x8f   :  { %v1130_v30 = vpop.eup %1129  ;;  %v1488_v3 = vmul.f32 -2.0, %v470_v38  ;;  %1149 = vrsqrt.f32 %v1482_v32  ;;  %v1491_v18 = vmul.f32 6.2831855, %v1103_v12  ;;  %v1493_v8 = vmul.f32 6.2831855, %v1104_v15 }
  0x90   :  { %v1132_v33 = vpop.eup %1131  ;;  %v1495_v27 = vmul.f32 6.2831855, %v1105_v62  ;;  %v1497_v60 = vmul.f32 6.2831855, %v1106_v54  ;;  %v476_v52 = vmul.f32 0.6931472, %v1128_v35  ;;  %1151 = vrsqrt.f32 %v1485_v34 }
  0x91   :  { %v1134_v28 = vpop.eup %1133  ;;  %v1499_v21 = vmul.f32 -2.0, %v472_v23  ;;  %v1502_v5 = vmul.f32 6.2831855, %v1107_v16  ;;  %v1504_v31 = vmul.f32 6.2831855, %v1108_v46  ;;  %v1510_v47 = vmul.f32 -2.0, %v474_v58 }
  0x92   :  { %v1136_v29 = vpop.eup %1135  ;;  %v1506_v49 = vmul.f32 6.2831855, %v1109_v45  ;;  %v1508_v24 = vmul.f32 6.2831855, %v1110_v57  ;;  %v478_v42 = vmul.f32 0.6931472, %v1130_v30  ;;  %1153 = vrsqrt.f32 %v1488_v3 }
  0x93   :  { %v1138_v56 = vpop.eup %1137  ;;  %v1513_v39 = vmul.f32 6.2831855, %v1111_v22  ;;  %v1515_v36 = vmul.f32 %v639_v14, %v639_v14  ;;  %v1517_v10 = vmul.f32 %v640_v0, %v640_v0  ;;  %v1519_v50 = vmul.f32 %v641_v6, %v641_v6 }
  0x94   :  { %v1140_v9 = vpop.eup %1139  ;;  %v1521_v51 = vmul.f32 %v642_v4, %v642_v4  ;;  %v480_v11 = vmul.f32 0.6931472, %v1132_v33  ;;  %v1523_v48 = vmul.f32 -2.0, %v476_v52  ;;  %1155 = vrsqrt.f32 %v1499_v21 }
  0x95   :  { %v1142_v59 = vpop.eup %1141  ;;  %v1526_v53 = vmul.f32 %v643_v44, %v643_v44  ;;  %v482_v40 = vmul.f32 0.6931472, %v1134_v28  ;;  %vm513_vm0 = vcmp.eq.f32.partialorder %v1479_v25, inf  ;;  %v1529_v41 = vmul.f32 %v644_v26, %v644_v26 }
  0x96   :  { %v1144_v61 = vpop.eup %1143  ;;  %v1531_v12 = vmul.f32 %v645_v17, %v645_v17  ;;  %v1533_v62 = vmul.f32 -2.0, %v478_v42  ;;  %vm515_vm1 = vcmp.eq.f32.partialorder %v1479_v25, 0.0  ;;  %v516_v43 = vand.u32 2147483648, %v1479_v25 }
  0x97   :  { %v1146_v15 = vpop.eup %1145  ;;  %vm520_vm2 = vcmp.eq.f32.partialorder %v1482_v32, inf  ;;  %1157 = vrsqrt.f32 %v1510_v47  ;;  %v484_v16 = vmul.f32 0.6931472, %v1136_v29  ;;  %vm522_vm3 = vcmp.eq.f32.partialorder %v1482_v32, 0.0 }
  0x98   :  { %v1148_v54 = vpop.eup %1147  ;;  %v523_v46 = vand.u32 2147483648, %v1482_v32  ;;  %vm527_vm4 = vcmp.eq.f32.partialorder %v1485_v34, inf  ;;  %v486_v19 = vmul.f32 0.6931472, %v1138_v56  ;;  %v488_v45 = vmul.f32 0.6931472, %v1140_v9 }
  0x99   :  { %v1150_v7 = vpop.eup %1149  ;;  %v1542_v57 = vmul.f32 -2.0, %v480_v11  ;;  %1159 = vrsqrt.f32 %v1523_v48  ;;  %v490_v63 = vmul.f32 0.6931472, %v1142_v59  ;;  %v1545_v13 = vmul.f32 -2.0, %v482_v40 }
  0x9a   :  { %vm529_vm5 = vcmp.eq.f32.partialorder %v1485_v34, 0.0  ;;  %v530_v22 = vand.u32 2147483648, %v1485_v34  ;;  %v1152_v14 = vpop.eup %1151  ;;  %v492_v55 = vmul.f32 0.6931472, %v1144_v61  ;;  %v512_v37 = vmul.f32 %v1148_v54, %v1479_v25 }
  0x9b   :  { %vm534_vm6 = vcmp.eq.f32.partialorder %v1488_v3, inf  ;;  %1161 = vrsqrt.f32 %v1533_v62  ;;  %v494_v0 = vmul.f32 0.6931472, %v1146_v15  ;;  %v1552_v20 = vmul.f32 -2.0, %v484_v16 }
  0x9c   :  { %v519_v38 = vmul.f32 %v1150_v7, %v1482_v32  ;;  %vm536_vm7 = vcmp.eq.f32.partialorder %v1488_v3, 0.0  ;;  %v537_v6 = vand.u32 2147483648, %v1488_v3  ;;  %v1154_v2 = vpop.eup %1153  ;;  %v1557_v23 = vmul.f32 -2.0, %v486_v19 }
  0x9d   :  { %v1559_v4 = vmul.f32 -2.0, %v488_v45  ;;  %vm541_vm8 = vcmp.eq.f32.partialorder %v1499_v21, inf  ;;  %1163 = vrsqrt.f32 %v1542_v57  ;;  %v1563_v35 = vmul.f32 -2.0, %v490_v63 }
  0x9e   :  { %v526_v44 = vmul.f32 %v1152_v14, %v1485_v34  ;;  %vm543_vm9 = vcmp.eq.f32.partialorder %v1499_v21, 0.0  ;;  %v544_v26 = vand.u32 2147483648, %v1499_v21  ;;  %vm548_vm10 = vcmp.eq.f32.partialorder %v1510_v47, inf  ;;  %v1156_v17 = vpop.eup %1155 }
  0x9f   :  { %v1569_v30 = vmul.f32 -2.0, %v492_v55  ;;  %v514_v58 = vsel %vm513_vm0, %v1479_v25, %v512_v37  ;;  %vm550_vm11 = vcmp.eq.f32.partialorder %v1510_v47, 0.0  ;;  %v551_v33 = vand.u32 2147483648, %v1510_v47 }
  0xa0   :  { %1165 = vrsqrt.f32 %v1545_v13  ;;  %v1577_v28 = vmul.f32 -2.0, %v494_v0  ;;  %v521_v52 = vsel %vm520_vm2, %v1482_v32, %v519_v38  ;;  %v533_v29 = vmul.f32 %v1154_v2, %v1488_v3 }
  0xa1   :  { %1167 = vrsqrt.f32 %v1552_v20  ;;  %v1158_v56 = vpop.eup %1157  ;;  %vm555_vm12 = vcmp.eq.f32.partialorder %v1523_v48, inf  ;;  %vm557_vm13 = vcmp.eq.f32.partialorder %v1523_v48, 0.0  ;;  %v558_v42 = vand.u32 2147483648, %v1523_v48 }
  0xa2   :  { %vm562_vm14 = vcmp.eq.f32.partialorder %v1533_v62, inf  ;;  %v1590_v9 = vsel %vm515_vm1, %v516_v43, %v514_v58  ;;  %v528_v59 = vsel %vm527_vm4, %v1485_v34, %v526_v44  ;;  %v540_v11 = vmul.f32 %v1156_v17, %v1499_v21 }
  0xa3   :  { %1169 = vrsqrt.f32 %v1557_v23  ;;  %v1160_v61 = vpop.eup %1159  ;;  %v1599_v40 = vsel %vm522_vm3, %v523_v46, %v521_v52  ;;  %v547_v15 = vmul.f32 %v1158_v56, %v1510_v47  ;;  %vm564_vm15 = vcmp.eq.f32.partialorder %v1533_v62, 0.0 }
  0xa4   :  { %1171 = vrsqrt.f32 %v1559_v4  ;;  %v535_v25 = vsel %vm534_vm6, %v1488_v3, %v533_v29  ;;  %v565_v43 = vand.u32 2147483648, %v1533_v62  ;;  %vm569_vm0 = vcmp.eq.f32.partialorder %v1542_v57, inf }
  0xa5   :  { %vm571_vm1 = vcmp.eq.f32.partialorder %v1542_v57, 0.0  ;;  %v1162_v54 = vpop.eup %1161  ;;  %v1612_v32 = vsel %vm529_vm5, %v530_v22, %v528_v59  ;;  %v554_v16 = vmul.f32 %v1160_v61, %v1523_v48  ;;  %v572_v46 = vand.u32 2147483648, %v1542_v57 }
  0xa6   :  { %1173 = vrsqrt.f32 %v1563_v35  ;;  %v542_v7 = vsel %vm541_vm8, %v1499_v21, %v540_v11  ;;  %v561_v19 = vmul.f32 %v1162_v54, %v1533_v62  ;;  %vm576_vm2 = vcmp.eq.f32.partialorder %v1545_v13, inf }
  0xa7   :  { %vm578_vm3 = vcmp.eq.f32.partialorder %v1545_v13, 0.0  ;;  %v1164_v45 = vpop.eup %1163  ;;  %v1625_v34 = vsel %vm536_vm7, %v537_v6, %v535_v25  ;;  %v549_v63 = vsel %vm548_vm10, %v1510_v47, %v547_v15  ;;  %v579_v22 = vand.u32 2147483648, %v1545_v13 }
  0xa8   :  { %vm583_vm4 = vcmp.eq.f32.partialorder %v1552_v20, inf  ;;  %v568_v14 = vmul.f32 %v1164_v45, %v1542_v57  ;;  %vm585_vm5 = vcmp.eq.f32.partialorder %v1552_v20, 0.0  ;;  %v586_v55 = vand.u32 2147483648, %v1552_v20 }
  0xa9   :  { %vm590_vm6 = vcmp.eq.f32.partialorder %v1557_v23, inf  ;;  %v1638_v3 = vsel %vm543_vm9, %v544_v26, %v542_v7  ;;  %v556_v0 = vsel %vm555_vm12, %v1523_v48, %v554_v16  ;;  %v593_v38 = vand.u32 2147483648, %v1557_v23 }
  0xaa   :  { %v1166_v37 = vpop.eup %1165  ;;  %vm597_vm7 = vcmp.eq.f32.partialorder %v1559_v4, inf  ;;  %v1647_v2 = vsel %vm550_vm11, %v551_v33, %v549_v63  ;;  %v563_v44 = vsel %vm562_vm14, %v1533_v62, %v561_v19  ;;  %vm592_vm8 = vcmp.eq.f32.partialorder %v1557_v23, 0.0 }
  0xab   :  { %v1168_v6 = vpop.eup %1167  ;;  %v575_v21 = vmul.f32 %v1166_v37, %v1545_v13  ;;  %v600_v26 = vand.u32 2147483648, %v1559_v4  ;;  %v570_v17 = vsel %vm569_vm0, %v1542_v57, %v568_v14  ;;  %vm604_vm9 = vcmp.eq.f32.partialorder %v1563_v35, inf }
  0xac   :  { %v607_v47 = vand.u32 2147483648, %v1563_v35  ;;  %1175 = vrsqrt.f32 %v1569_v30  ;;  %v1663_v33 = vsel %vm557_vm13, %v558_v42, %v556_v0  ;;  %v582_v52 = vmul.f32 %v1168_v6, %v1552_v20 }
  0xad   :  { %v1170_v58 = vpop.eup %1169  ;;  %vm599_vm10 = vcmp.eq.f32.partialorder %v1559_v4, 0.0  ;;  %1177 = vrsqrt.f32 %v1577_v28  ;;  %v1671_v59 = vsel %vm564_vm15, %v565_v43, %v563_v44  ;;  %v577_v11 = vsel %vm576_vm2, %v1545_v13, %v575_v21 }
  0xae   :  { %v1172_v56 = vpop.eup %1171  ;;  %v589_v48 = vmul.f32 %v1170_v58, %v1557_v23  ;;  %v1680_v61 = vsel %vm571_vm1, %v572_v46, %v570_v17  ;;  %vm606_vm11 = vcmp.eq.f32.partialorder %v1563_v35, 0.0  ;;  %v1685_v15 = vmul.f32 %v1491_v18, %v1491_v18 }
  0xaf   :  { %v1689_v62 = vmul.f32 %v1493_v8, %v1493_v8  ;;  %v1693_v25 = vmul.f32 %v1495_v27, %v1495_v27  ;;  %v1697_v57 = vmul.f32 %v1497_v60, %v1497_v60  ;;  %v1701_v54 = vmul.f32 %v1502_v5, %v1502_v5 }
  0xb0   :  { %v1174_v43 = vpop.eup %1173  ;;  %v1705_v18 = vmul.f32 %v1504_v31, %v1504_v31  ;;  %v1709_v8 = vmul.f32 %v1506_v49, %v1506_v49  ;;  %v1713_v27 = vsel %vm578_vm3, %v579_v22, %v577_v11  ;;  %v584_v60 = vsel %vm583_vm4, %v1552_v20, %v582_v52 }
  0xb1   :  { %1932 = vst [vmem:[#allocation11_spill] sm:$0xff] %v1713_v27  ;;  %v596_v16 = vmul.f32 %v1172_v56, %v1559_v4  ;;  %v1721_v5 = vmul.f32 %v1508_v24, %v1508_v24  ;;  %v591_v31 = vsel %vm590_vm6, %v1557_v23, %v589_v48  ;;  %v1728_v49 = vmul.f32 %v1513_v39, %v1513_v39 }
  0xb2   :  { %v671_v13 = vmul.f32 -1.1470745e-11, %v1515_v36  ;;  %v672_v46 = vmul.f32 -1.1470745e-11, %v1517_v10  ;;  %v603_v7 = vmul.f32 %v1174_v43, %v1563_v35  ;;  %v673_v19 = vmul.f32 -1.1470745e-11, %v1519_v50 }
  0xb3   :  { %v674_v45 = vmul.f32 -1.1470745e-11, %v1521_v51  ;;  %v675_v24 = vmul.f32 -1.1470745e-11, %v1526_v53  ;;  %v1738_v63 = vsel %vm585_vm5, %v586_v55, %v584_v60  ;;  %v676_v22 = vmul.f32 -1.1470745e-11, %v1529_v41 }
  0xb4   :  { %1933 = vst [vmem:[#allocation12_spill] sm:$0xff] %v1738_v63  ;;  %v677_v39 = vmul.f32 -1.1470745e-11, %v1531_v12  ;;  %v678_v14 = vmul.f32 -1.1470745e-11, %v1685_v15  ;;  %v598_v37 = vsel %vm597_vm7, %v1559_v4, %v596_v16  ;;  %v1751_v20 = vsel %vm592_vm8, %v593_v38, %v591_v31 }
  0xb5   :  { %v679_v0 = vmul.f32 -1.1470745e-11, %v1689_v62  ;;  %v680_v6 = vmul.f32 -1.1470745e-11, %v1693_v25  ;;  %v681_v44 = vmul.f32 -1.1470745e-11, %v1697_v57  ;;  %v605_v56 = vsel %vm604_vm9, %v1563_v35, %v603_v7 }
  0xb6   :  { %v1176_v21 = vpop.eup %1175  ;;  %1934 = vst [vmem:[#allocation13_spill] sm:$0xff] %v1751_v20  ;;  %v682_v55 = vmul.f32 -1.1470745e-11, %v1701_v54  ;;  %v683_v17 = vmul.f32 -1.1470745e-11, %v1705_v18  ;;  %v1763_v23 = vsel %vm599_vm10, %v600_v26, %v598_v37  ;;  %v1770_v7 = vsel %vm606_vm11, %v607_v47, %v605_v56 }
  0xb7   :  { %v684_v58 = vmul.f32 -1.1470745e-11, %v1709_v8  ;;  %v1178_v52 = vpop.eup %1177  ;;  %v685_v11 = vmul.f32 -1.1470745e-11, %v1721_v5  ;;  %v686_v48 = vmul.f32 -1.1470745e-11, %v1728_v49  ;;  %v1766_v31 = vmul.f32 %v1176_v21, %v1569_v30 }
  0xb8   :  { %v687_v43 = vadd.f32 2.0876756e-09, %v671_v13  ;;  %v688_v38 = vadd.f32 2.0876756e-09, %v672_v46  ;;  %v689_v60 = vadd.f32 2.0876756e-09, %v673_v19 }
  0xb9   :  { %v690_v16 = vadd.f32 2.0876756e-09, %v674_v45  ;;  %v691_v42 = vadd.f32 2.0876756e-09, %v675_v24  ;;  %v692_v29 = vadd.f32 2.0876756e-09, %v676_v22 }
  0xba   :  { %v693_v1 = vadd.f32 2.0876756e-09, %v677_v39  ;;  %v694_v20 = vadd.f32 2.0876756e-09, %v678_v14  ;;  %v695_v63 = vadd.f32 2.0876756e-09, %v679_v0  ;;  %v703_v46 = vmul.f32 %v687_v43, %v1515_v36 }
  0xbb   :  { %v696_v13 = vadd.f32 2.0876756e-09, %v680_v6  ;;  %v697_v27 = vadd.f32 2.0876756e-09, %v681_v44  ;;  %v698_v4 = vadd.f32 2.0876756e-09, %v682_v55  ;;  %v704_v45 = vmul.f32 %v688_v38, %v1517_v10 }
  0xbc   :  { %v699_v26 = vadd.f32 2.0876756e-09, %v683_v17  ;;  %v700_v19 = vadd.f32 2.0876756e-09, %v684_v58  ;;  %v705_v37 = vmul.f32 %v689_v60, %v1519_v50  ;;  %v706_v24 = vmul.f32 %v690_v16, %v1521_v51 }
  0xbd   :  { %v701_v22 = vadd.f32 2.0876756e-09, %v685_v11  ;;  %v707_v35 = vmul.f32 %v691_v42, %v1526_v53  ;;  %v708_v47 = vmul.f32 %v692_v29, %v1529_v41  ;;  %v709_v39 = vmul.f32 %v693_v1, %v1531_v12 }
  0xbe   :  { %v702_v14 = vadd.f32 2.0876756e-09, %v686_v48  ;;  %v710_v0 = vmul.f32 %v694_v20, %v1685_v15  ;;  %v711_v6 = vmul.f32 %v695_v63, %v1689_v62  ;;  %v712_v44 = vmul.f32 %v696_v13, %v1693_v25 }
  0xbf   :  { %v713_v21 = vmul.f32 %v697_v27, %v1697_v57  ;;  %v714_v55 = vmul.f32 %v698_v4, %v1701_v54  ;;  %v715_v17 = vmul.f32 %v699_v26, %v1705_v18  ;;  %v719_v58 = vadd.f32 -2.755732e-07, %v703_v46 }
  0xc0   :  { %vm611_vm12 = vcmp.eq.f32.partialorder %v1569_v30, inf  ;;  %v716_v29 = vmul.f32 %v700_v19, %v1709_v8  ;;  %v720_v42 = vadd.f32 -2.755732e-07, %v704_v45  ;;  %v721_v1 = vadd.f32 -2.755732e-07, %v705_v37 }
  0xc1   :  { %v722_v56 = vadd.f32 -2.755732e-07, %v706_v24  ;;  %v717_v20 = vmul.f32 %v701_v22, %v1721_v5  ;;  %v723_v11 = vadd.f32 -2.755732e-07, %v707_v35  ;;  %v724_v63 = vadd.f32 -2.755732e-07, %v708_v47 }
  0xc2   :  { %v725_v48 = vadd.f32 -2.755732e-07, %v709_v39  ;;  %v718_v43 = vmul.f32 %v702_v14, %v1728_v49  ;;  %v726_v27 = vadd.f32 -2.755732e-07, %v710_v0  ;;  %v727_v38 = vadd.f32 -2.755732e-07, %v711_v6 }
  0xc3   :  { %v728_v60 = vadd.f32 -2.755732e-07, %v712_v44  ;;  %v1790_v16 = vmul.f32 %v1178_v52, %v1577_v28  ;;  %v729_v13 = vadd.f32 -2.755732e-07, %v713_v21  ;;  %v730_v4 = vadd.f32 -2.755732e-07, %v714_v55 }
  0xc4   :  { %v731_v26 = vadd.f32 -2.755732e-07, %v715_v17  ;;  %v732_v46 = vadd.f32 -2.755732e-07, %v716_v29  ;;  %v735_v19 = vmul.f32 %v719_v58, %v1515_v36  ;;  %v736_v45 = vmul.f32 %v720_v42, %v1517_v10 }
  0xc5   :  { %v737_v37 = vmul.f32 %v721_v1, %v1519_v50  ;;  %v733_v24 = vadd.f32 -2.755732e-07, %v717_v20  ;;  %v738_v22 = vmul.f32 %v722_v56, %v1521_v51  ;;  %v739_v35 = vmul.f32 %v723_v11, %v1526_v53 }
  0xc6   :  { %v740_v47 = vmul.f32 %v724_v63, %v1529_v41  ;;  %v734_v39 = vadd.f32 -2.755732e-07, %v718_v43  ;;  %v741_v52 = vmul.f32 %v725_v48, %v1531_v12  ;;  %v742_v14 = vmul.f32 %v726_v27, %v1685_v15 }
  0xc7   :  { %v743_v0 = vmul.f32 %v727_v38, %v1689_v62  ;;  %v744_v6 = vmul.f32 %v728_v60, %v1693_v25  ;;  %v745_v44 = vmul.f32 %v729_v13, %v1697_v57  ;;  %v746_v21 = vmul.f32 %v730_v4, %v1701_v54 }
  0xc8   :  { %v747_v55 = vmul.f32 %v731_v26, %v1705_v18  ;;  %vm618_vm13 = vcmp.eq.f32.partialorder %v1577_v28, inf  ;;  %v748_v17 = vmul.f32 %v732_v46, %v1709_v8  ;;  %v751_v58 = vadd.f32 2.4801588e-05, %v735_v19 }
  0xc9   :  { %v752_v29 = vadd.f32 2.4801588e-05, %v736_v45  ;;  %v753_v42 = vadd.f32 2.4801588e-05, %v737_v37  ;;  %v749_v1 = vmul.f32 %v733_v24, %v1721_v5  ;;  %v754_v56 = vadd.f32 2.4801588e-05, %v738_v22 }
  0xca   :  { %v755_v20 = vadd.f32 2.4801588e-05, %v739_v35  ;;  %v756_v11 = vadd.f32 2.4801588e-05, %v740_v47  ;;  %v750_v63 = vmul.f32 %v734_v39, %v1728_v49  ;;  %v757_v48 = vadd.f32 2.4801588e-05, %v741_v52 }
  0xcb   :  { %v758_v43 = vadd.f32 2.4801588e-05, %v742_v14  ;;  %v759_v27 = vadd.f32 2.4801588e-05, %v743_v0  ;;  %v1813_v38 = vsel %vm611_vm12, %v1569_v30, %v1766_v31  ;;  %v760_v60 = vadd.f32 2.4801588e-05, %v744_v6 }
  0xcc   :  { %v761_v13 = vadd.f32 2.4801588e-05, %v745_v44  ;;  %v762_v4 = vadd.f32 2.4801588e-05, %v746_v21  ;;  %v763_v26 = vadd.f32 2.4801588e-05, %v747_v55  ;;  %v767_v19 = vmul.f32 %v751_v58, %v1515_v36 }
  0xcd   :  { %v764_v46 = vadd.f32 2.4801588e-05, %v748_v17  ;;  %v768_v45 = vmul.f32 %v752_v29, %v1517_v10  ;;  %v765_v37 = vadd.f32 2.4801588e-05, %v749_v1  ;;  %v769_v24 = vmul.f32 %v753_v42, %v1519_v50 }
  0xce   :  { %v770_v22 = vmul.f32 %v754_v56, %v1521_v51  ;;  %v771_v35 = vmul.f32 %v755_v20, %v1526_v53  ;;  %v766_v47 = vadd.f32 2.4801588e-05, %v750_v63  ;;  %v772_v31 = vmul.f32 %v756_v11, %v1529_v41 }
  0xcf   :  { %v773_v39 = vmul.f32 %v757_v48, %v1531_v12  ;;  %v774_v52 = vmul.f32 %v758_v43, %v1685_v15  ;;  %v775_v14 = vmul.f32 %v759_v27, %v1689_v62  ;;  %v776_v0 = vmul.f32 %v760_v60, %v1693_v25 }
  0xd0   :  { %v777_v6 = vmul.f32 %v761_v13, %v1697_v57  ;;  %v778_v44 = vmul.f32 %v762_v4, %v1701_v54  ;;  %vm613_vm14 = vcmp.eq.f32.partialorder %v1569_v30, 0.0  ;;  %v779_v21 = vmul.f32 %v763_v26, %v1705_v18 }
  0xd1   :  { %v780_v55 = vmul.f32 %v764_v46, %v1709_v8  ;;  %v783_v17 = vadd.f32 -0.0013888889, %v767_v19  ;;  %v784_v58 = vadd.f32 -0.0013888889, %v768_v45  ;;  %vm620_vm15 = vcmp.eq.f32.partialorder %v1577_v28, 0.0 }
  0xd2   :  { %v781_v29 = vmul.f32 %v765_v37, %v1721_v5  ;;  %v785_v42 = vadd.f32 -0.0013888889, %v769_v24  ;;  %v786_v1 = vadd.f32 -0.0013888889, %v770_v22  ;;  %v787_v56 = vadd.f32 -0.0013888889, %v771_v35 }
  0xd3   :  { %v782_v20 = vmul.f32 %v766_v47, %v1728_v49  ;;  %v788_v11 = vadd.f32 -0.0013888889, %v772_v31  ;;  %v789_v63 = vadd.f32 -0.0013888889, %v773_v39  ;;  %v790_v48 = vadd.f32 -0.0013888889, %v774_v52 }
  0xd4   :  { %v619_v43 = vsel %vm618_vm13, %v1577_v28, %v1790_v16  ;;  %v791_v27 = vadd.f32 -0.0013888889, %v775_v14  ;;  %v792_v60 = vadd.f32 -0.0013888889, %v776_v0  ;;  %v793_v13 = vadd.f32 -0.0013888889, %v777_v6 }
  0xd5   :  { %v794_v4 = vadd.f32 -0.0013888889, %v778_v44  ;;  %v795_v26 = vadd.f32 -0.0013888889, %v779_v21  ;;  %v796_v46 = vadd.f32 -0.0013888889, %v780_v55  ;;  %v799_v19 = vmul.f32 %v783_v17, %v1515_v36 }
  0xd6   :  { %v797_v45 = vadd.f32 -0.0013888889, %v781_v29  ;;  %v800_v37 = vmul.f32 %v784_v58, %v1517_v10  ;;  %v801_v24 = vmul.f32 %v785_v42, %v1519_v50  ;;  %v802_v22 = vmul.f32 %v786_v1, %v1521_v51 }
  0xd7   :  { %v798_v35 = vadd.f32 -0.0013888889, %v782_v20  ;;  %v803_v47 = vmul.f32 %v787_v56, %v1526_v53  ;;  %v804_v16 = vmul.f32 %v788_v11, %v1529_v41  ;;  %v805_v31 = vmul.f32 %v789_v63, %v1531_v12 }
  0xd8   :  { %v806_v39 = vmul.f32 %v790_v48, %v1685_v15  ;;  %v807_v52 = vmul.f32 %v791_v27, %v1689_v62  ;;  %v808_v14 = vmul.f32 %v792_v60, %v1693_v25  ;;  %v809_v0 = vmul.f32 %v793_v13, %v1697_v57 }
  0xd9   :  { %v810_v6 = vmul.f32 %v794_v4, %v1701_v54  ;;  %v811_v44 = vmul.f32 %v795_v26, %v1705_v18  ;;  %v812_v21 = vmul.f32 %v796_v46, %v1709_v8  ;;  %v815_v55 = vadd.f32 0.041666668, %v799_v19 }
  0xda   :  { %v813_v17 = vmul.f32 %v797_v45, %v1721_v5  ;;  %v816_v58 = vadd.f32 0.041666668, %v800_v37  ;;  %v817_v29 = vadd.f32 0.041666668, %v801_v24  ;;  %v818_v42 = vadd.f32 0.041666668, %v802_v22 }
  0xdb   :  { %v814_v1 = vmul.f32 %v798_v35, %v1728_v49  ;;  %v819_v56 = vadd.f32 0.041666668, %v803_v47  ;;  %v820_v20 = vadd.f32 0.041666668, %v804_v16  ;;  %v821_v11 = vadd.f32 0.041666668, %v805_v31 }
  0xdc   :  { %v1935_v63 = vand.u32 2147483648, %v1569_v30  ;;  %v822_v27 = vadd.f32 0.041666668, %v806_v39  ;;  %v823_v60 = vadd.f32 0.041666668, %v807_v52  ;;  %v1936_v4 = vand.u32 2147483648, %v1577_v28 }
  0xdd   :  { %v824_v13 = vadd.f32 0.041666668, %v808_v14  ;;  %v825_v46 = vadd.f32 0.041666668, %v809_v0  ;;  %v826_v19 = vadd.f32 0.041666668, %v810_v6  ;;  %v831_v22 = vmul.f32 %v815_v55, %v1515_v36 }
  0xde   :  { %v1858_v48 = vsel %vm613_vm14, %v1935_v63, %v1813_v38  ;;  %v1864_v26 = vsel %vm620_vm15, %v1936_v4, %v619_v43  ;;  %v827_v45 = vadd.f32 0.041666668, %v811_v44  ;;  %v828_v37 = vadd.f32 0.041666668, %v812_v21 }
  0xdf   :  { %v829_v24 = vadd.f32 0.041666668, %v813_v17  ;;  %v832_v30 = vmul.f32 %v816_v58, %v1517_v10  ;;  %v830_v38 = vadd.f32 0.041666668, %v814_v1  ;;  %v833_v35 = vmul.f32 %v817_v29, %v1519_v50 }
  0xe0   :  { %v834_v47 = vmul.f32 %v818_v42, %v1521_v51  ;;  %v835_v16 = vmul.f32 %v819_v56, %v1526_v53  ;;  %v836_v28 = vmul.f32 %v820_v20, %v1529_v41  ;;  %v837_v43 = vmul.f32 %v821_v11, %v1531_v12 }
  0xe1   :  { %v838_v31 = vmul.f32 %v822_v27, %v1685_v15  ;;  %v839_v39 = vmul.f32 %v823_v60, %v1689_v62  ;;  %v840_v52 = vmul.f32 %v824_v13, %v1693_v25  ;;  %v841_v14 = vmul.f32 %v825_v46, %v1697_v57 }
  0xe2   :  { %v842_v0 = vmul.f32 %v826_v19, %v1701_v54  ;;  %v843_v6 = vmul.f32 %v827_v45, %v1705_v18  ;;  %v844_v44 = vmul.f32 %v828_v37, %v1709_v8  ;;  %v845_v21 = vmul.f32 %v829_v24, %v1721_v5 }
  0xe3   :  { %v847_v55 = vadd.f32 -0.5, %v831_v22  ;;  %v848_v17 = vadd.f32 -0.5, %v832_v30  ;;  %v846_v58 = vmul.f32 %v830_v38, %v1728_v49  ;;  %v849_v29 = vadd.f32 -0.5, %v833_v35 }
  0xe4   :  { %v850_v42 = vadd.f32 -0.5, %v834_v47  ;;  %v851_v1 = vadd.f32 -0.5, %v835_v16  ;;  %v852_v56 = vadd.f32 -0.5, %v836_v28  ;;  %v853_v20 = vadd.f32 -0.5, %v837_v43 }
  0xe5   :  { %v854_v11 = vadd.f32 -0.5, %v838_v31  ;;  %v855_v63 = vadd.f32 -0.5, %v839_v39  ;;  %v856_v27 = vadd.f32 -0.5, %v840_v52  ;;  %v857_v60 = vadd.f32 -0.5, %v841_v14 }
  0xe6   :  { %v858_v13 = vadd.f32 -0.5, %v842_v0  ;;  %v859_v4 = vadd.f32 -0.5, %v843_v6  ;;  %v860_v46 = vadd.f32 -0.5, %v844_v44  ;;  %v861_v19 = vadd.f32 -0.5, %v845_v21 }
  0xe7   :  { %v863_v45 = vmul.f32 %v847_v55, %v1515_v36  ;;  %v864_v37 = vmul.f32 %v848_v17, %v1517_v10  ;;  %v862_v24 = vadd.f32 -0.5, %v846_v58  ;;  %v865_v22 = vmul.f32 %v849_v29, %v1519_v50 }
  0xe8   :  { %v866_v30 = vmul.f32 %v850_v42, %v1521_v51  ;;  %v867_v38 = vmul.f32 %v851_v1, %v1526_v53  ;;  %v868_v35 = vmul.f32 %v852_v56, %v1529_v41  ;;  %v869_v47 = vmul.f32 %v853_v20, %v1531_v12 }
  0xe9   :  { %v870_v16 = vmul.f32 %v854_v11, %v1685_v15  ;;  %v871_v28 = vmul.f32 %v855_v63, %v1689_v62  ;;  %v872_v43 = vmul.f32 %v856_v27, %v1693_v25  ;;  %v873_v36 = vmul.f32 %v857_v60, %v1697_v57 }
  0xea   :  { %v874_v10 = vmul.f32 %v858_v13, %v1701_v54  ;;  %v875_v50 = vmul.f32 %v859_v4, %v1705_v18  ;;  %v876_v51 = vmul.f32 %v860_v46, %v1709_v8  ;;  %v877_v53 = vmul.f32 %v861_v19, %v1721_v5 }
  0xeb   :  { %v879_v31 = vadd.f32 1.0, %v863_v45  ;;  %v880_v41 = vadd.f32 1.0, %v864_v37  ;;  %v878_v12 = vmul.f32 %v862_v24, %v1728_v49  ;;  %v881_v39 = vadd.f32 1.0, %v865_v22 }
  0xec   :  { %v882_v15 = vadd.f32 1.0, %v866_v30  ;;  %v883_v52 = vadd.f32 1.0, %v867_v38  ;;  %v884_v62 = vadd.f32 1.0, %v868_v35  ;;  %v885_v14 = vadd.f32 1.0, %v869_v47  ;;  %v1937_v47 = vld [vmem:[#allocation11_spill] sm:$0xff] }
  0xed   :  { %v886_v25 = vadd.f32 1.0, %v870_v16  ;;  %v887_v0 = vadd.f32 1.0, %v871_v28  ;;  %v888_v57 = vadd.f32 1.0, %v872_v43  ;;  %v889_v6 = vadd.f32 1.0, %v873_v36 }
  0xee   :  { %v890_v54 = vadd.f32 1.0, %v874_v10  ;;  %v891_v44 = vadd.f32 1.0, %v875_v50  ;;  %v892_v18 = vadd.f32 1.0, %v876_v51  ;;  %v893_v21 = vadd.f32 1.0, %v877_v53 }
  0xef   :  { %v895_v8 = vsub.f32 0.0, %v879_v31  ;;  %v896_v55 = vsub.f32 0.0, %v880_v41  ;;  %v894_v5 = vadd.f32 1.0, %v878_v12  ;;  %v897_v17 = vsub.f32 0.0, %v881_v39 }
  0xf0   :  { %v898_v58 = vsub.f32 0.0, %v882_v15  ;;  %v899_v29 = vsub.f32 0.0, %v883_v52  ;;  %v900_v49 = vsub.f32 0.0, %v884_v62  ;;  %v901_v42 = vsub.f32 0.0, %v885_v14 }
  0xf1   :  { %v902_v1 = vsub.f32 0.0, %v886_v25  ;;  %v903_v56 = vsub.f32 0.0, %v887_v0  ;;  %v904_v20 = vsub.f32 0.0, %v888_v57  ;;  %v905_v11 = vsub.f32 0.0, %v889_v6 }
  0xf2   :  { %v906_v63 = vsub.f32 0.0, %v890_v54  ;;  %v907_v27 = vsub.f32 0.0, %v891_v44  ;;  %v908_v60 = vsub.f32 0.0, %v892_v18  ;;  %v909_v13 = vsub.f32 0.0, %v893_v21 }
  0xf3   :  { %v911_v4 = vmul.f32 %v895_v8, %v1590_v9  ;;  %v912_v46 = vmul.f32 %v896_v55, %v1599_v40  ;;  %v910_v19 = vsub.f32 0.0, %v894_v5  ;;  %v913_v45 = vmul.f32 %v897_v17, %v1612_v32  ;;  %v1938_v9 = vld [vmem:[#allocation12_spill] sm:$0xff]  ;;  %v1939_v40 = vld [vmem:[#allocation13_spill] sm:$0xff] }
  0xf4   :  { %v914_v37 = vmul.f32 %v898_v58, %v1625_v34  ;;  %v915_v24 = vmul.f32 %v899_v29, %v1638_v3  ;;  %v916_v22 = vmul.f32 %v900_v49, %v1647_v2  ;;  %v917_v30 = vmul.f32 %v901_v42, %v1663_v33 }
  0xf5   :  { %v918_v38 = vmul.f32 %v902_v1, %v1671_v59  ;;  %v919_v35 = vmul.f32 %v903_v56, %v1680_v61  ;;  %v920_v16 = vmul.f32 %v904_v20, %v1937_v47  ;;  %v921_v28 = vmul.f32 %v905_v11, %v1938_v9 }
  0xf6   :  { %v922_v43 = vmul.f32 %v906_v63, %v1939_v40  ;;  %v923_v32 = vmul.f32 %v907_v27, %v1763_v23  ;;  %v924_v34 = vmul.f32 %v908_v60, %v1770_v7  ;;  %v925_v3 = vmul.f32 %v909_v13, %v1858_v48  ;;  %v1940_v13 = vld [vmem:[#allocation10_spill] sm:$0xff] }
  0xf7   :  { %v929_v36 = vmul.f32 0.1, %v911_v4  ;;  %v930_v2 = vmul.f32 0.1, %v912_v46  ;;  %v926_v33 = vmul.f32 %v910_v19, %v1864_v26  ;;  %v931_v10 = vmul.f32 0.1, %v913_v45 }
  0xf8   :  { %v932_v59 = vmul.f32 0.1, %v914_v37  ;;  %v933_v50 = vmul.f32 0.1, %v915_v24  ;;  %v934_v61 = vmul.f32 0.1, %v916_v22 }
  0xf9   :  { %v935_v51 = vmul.f32 0.1, %v917_v30  ;;  %v936_v53 = vmul.f32 0.1, %v918_v38  ;;  %v937_v31 = vmul.f32 0.1, %v919_v35 }
  0xfa   :  { %v938_v41 = vmul.f32 0.1, %v920_v16  ;;  %v939_v12 = vmul.f32 0.1, %v921_v28  ;;  %v940_v39 = vmul.f32 0.1, %v922_v43 }
  0xfb   :  { %v941_v15 = vmul.f32 0.1, %v923_v32  ;;  %v942_v23 = vmul.f32 0.1, %v924_v34  ;;  %v943_v52 = vmul.f32 0.1, %v925_v3 }
  0xfc   :  { %v944_v7 = vmul.f32 0.1, %v926_v33  ;;  %v945_v62 = vadd.f32 1.0, %v929_v36  ;;  %v946_v48 = vadd.f32 1.0, %v930_v2  ;;  %v947_v14 = vadd.f32 1.0, %v931_v10  ;;  %v927_v43 = vld [vmem:[#allocation4] sm:$0xff] }
  0xfd   :  { %v948_v25 = vadd.f32 1.0, %v932_v59  ;;  %v949_v0 = vadd.f32 1.0, %v933_v50  ;;  %v950_v26 = vadd.f32 1.0, %v934_v61  ;;  %v951_v57 = vadd.f32 1.0, %v935_v51  ;;  %v928_v3 = vld [vmem:[#allocation4 + $0x8] sm:$0xff] }
  0xfe   :  { %v952_v6 = vadd.f32 1.0, %v936_v53  ;;  %v953_v54 = vadd.f32 1.0, %v937_v31  ;;  %v954_v44 = vadd.f32 1.0, %v938_v41  ;;  %v955_v18 = vadd.f32 1.0, %v939_v12 }
  0xff   :  { %v956_v21 = vadd.f32 1.0, %v940_v39  ;;  %v957_v8 = vadd.f32 1.0, %v941_v15  ;;  %v958_v55 = vadd.f32 1.0, %v942_v23  ;;  %v959_v5 = vadd.f32 1.0, %v943_v52 }
 0x100   :  { %v960_v17 = vadd.f32 1.0, %v944_v7  ;;  %v1228_v58 = vmov 1966171168   ;;  %v977_v49 = vcombine.low %v945_v62, %v946_v48  ;;  %v978_v42 = vcombine.low %v947_v14, %v948_v25 }
 0x101   :  { %v982_v29 = vunpack.c.l.s4 %v1228_v58  ;;  %v979_v1 = vcombine.low %v949_v0, %v950_v26  ;;  %v980_v56 = vcombine.low %v951_v57, %v952_v6  ;;  %v1026_v11 = vcombine.low %v953_v54, %v954_v44 }
 0x102   :  { %v1027_v63 = vcombine.low %v955_v18, %v956_v21  ;;  %v1028_v27 = vcombine.low %v957_v8, %v958_v55  ;;  %v1029_v60 = vcombine.low %v959_v5, %v960_v17 }
 0x103   :  { %v983_v20 = vunpack.c.0.s8 %v982_v29 }
 0x105   :  { %v986_v4 = vsub.s32 %v983_v20, %v1940_v13 }
 0x107   :  { %v987_v46 = vrot.slane %v977_v49, %v986_v4  ;;  %v994_v19 = vrot.slane %v978_v42, %v986_v4  ;;  %v1001_v45 = vrot.slane %v979_v1, %v986_v4  ;;  %v1008_v37 = vrot.slane %v980_v56, %v986_v4 }
 0x108   :  { %v1036_v24 = vrot.slane %v1026_v11, %v986_v4  ;;  %v1043_v22 = vrot.slane %v1027_v63, %v986_v4  ;;  %v1050_v30 = vrot.slane %v1028_v27, %v986_v4  ;;  %v1057_v38 = vrot.slane %v1029_v60, %v986_v4 }
 0x109   :  { %v1009_v35 = vcombine.low %v987_v46, %v994_v19  ;;  %v1010_v47 = vcombine.low %v1001_v45, %v1008_v37 }
 0x10a   :  { %v1058_v16 = vcombine.low %v1036_v24, %v1043_v22  ;;  %v1059_v9 = vcombine.low %v1050_v30, %v1057_v38 }
 0x10b   :  { %v1017_v28 = vrot.slane %v1009_v35, %v986_v4  ;;  %v1024_v40 = vrot.slane %v1010_v47, %v986_v4 }
 0x10c   :  { %v1066_v32 = vrot.slane %v1058_v16, %v986_v4  ;;  %v1073_v34 = vrot.slane %v1059_v9, %v986_v4 }
 0x10d   :  { %v1025_v36 = vcombine.low %v1017_v28, %v1024_v40 }
 0x10e   :  { %v1074_v2 = vcombine.low %v1066_v32, %v1073_v34 }
 0x10f   :  { %v1077_v33 = vmul.f32 %v1025_v36, %v927_v43 }
 0x110   :  { %v1078_v10 = vmul.f32 %v1074_v2, %v928_v3 }
 0x111   :  { %1079 = vst [vmem:[#allocation7] sm:$0xff] %v1077_v33 }
 0x112   :  { %1080 = vst [vmem:[#allocation7 + $0x8] sm:$0xff] %v1078_v10 }
 0x113   :  { %1212 = shalt.err (!%p1209_p12)
}
 0x114   :  { %s1213_s26 = scalar_lea.hbm %s1929_s2, 256 }
 0x115   :  { %p1214_p13 = scmp.ne.s32.totalorder %s1929_s2, %s1213_s26  ;;  %p1217_p0 = scmp.lt.u32.totalorder %s1213_s26, %s1929_s2 }
 0x117   :  { %p1219_p1 = pnand %p1217_p0, %p1214_p13 }
 0x119   :  { %1222 = shalt.err (!%p1219_p1)
}
 0x11a   :  { %1090 = dma.vmem_to_hbm [thread:$0]  %s1088_s1, 256, %s1929_s2, [#allocation6]  }
 0x11b   :  { %1225 = dma.done.wait [#allocation6], 256  }
 0x11c   :  { %1226 = vsyncadd [#allocation6], 4294967040 }
 0x11d   :  { %1094 = vsyncpa [#allocation5], 1 }
 0x11e   :  { %1095 = vsyncpa [#allocation6], 1 }

</bundles_post_ra>
